<compile_context>
chip_gen: v5e
topology: v5e:2x2
jax: 0.10.0
libtpu: 0.0.40
codegen_flags: <defaults>
</compile_context>

<pallas_src>
import functools

import jax
import jax.numpy as jnp
from jax.experimental import pallas as pl
from jax.experimental.pallas import tpu as pltpu

_EPS = 1e-5  # PyTorch InstanceNorm2d default


def _round_up(x, m):
    return (x + m - 1) // m * m


def _conv3x3_in_relu_stage(pad_ref, w_ref, not_left, not_right, HW, W, PAD):
    """One (Conv3x3, bias=False) -> InstanceNorm -> ReLU stage.

    pad_ref : VMEM (C, PAD + HW + PAD) f32; zeros in both halos, image (row-major
              flattened) starting at lane offset PAD.
    w_ref   : VMEM (9, C_out, C) f32; tap-major (ki*3+kj, o, c).
    Returns : (C_out, HW) f32.
    """
    acc = None
    for kj, dj in enumerate((-1, 0, 1)):
        part = None
        for ki, di in enumerate((-1, 0, 1)):
            t = ki * 3 + kj
            # One static lane-offset slice of the whole (C, HW) image per tap.
            tap = pad_ref[:, pl.ds(PAD + di * W + dj, HW)]
            prod = jnp.dot(w_ref[t], tap,
                           preferred_element_type=jnp.float32,
                           precision=jax.lax.Precision.HIGHEST)
            part = prod if part is None else part + prod
        # Row over/underflow is handled by the zero halos; only column wrap
        # (dj = +-1 at the image edge) needs masking, applied once per group.
        if dj == -1:
            part = jnp.where(not_left, part, 0.0)
        elif dj == 1:
            part = jnp.where(not_right, part, 0.0)
        acc = part if acc is None else acc + part

    # Per-(image, channel) instance norm (biased variance) + ReLU.
    mean = jnp.mean(acc, axis=1, keepdims=True)
    cent = acc - mean
    var = jnp.mean(cent * cent, axis=1, keepdims=True)
    return jnp.maximum(cent * jax.lax.rsqrt(var + _EPS), 0.0)


def _double_conv_kernel(x_ref, w1_ref, w2_ref, o_ref, xpad_ref, hpad_ref,
                        *, H, W, PAD):
    # x_ref   : (1, C_in,  H*W)          VMEM
    # w1_ref  : (9, C_out, C_in)         VMEM (tap-major)
    # w2_ref  : (9, C_out, C_out)        VMEM (tap-major)
    # o_ref   : (1, C_out, H*W)          VMEM
    # xpad_ref: (C_in,  PAD + H*W + PAD) VMEM scratch
    # hpad_ref: (C_out, PAD + H*W + PAD) VMEM scratch
    C_in = x_ref.shape[1]
    C_out = o_ref.shape[1]
    HW = H * W

    # Column-edge masks, computed once and shared by both stages.
    col = jax.lax.broadcasted_iota(jnp.int32, (1, HW), 1) % W
    not_left = col >= 1          # valid output columns for dj == -1 taps
    not_right = col < (W - 1)    # valid output columns for dj == +1 taps

    # Zero only the halos (aligned 128-wide stores); interior is fully
    # overwritten each grid step, so no cross-step init is assumed.
    xpad_ref[:, pl.ds(0, PAD)] = jnp.zeros((C_in, PAD), jnp.float32)
    xpad_ref[:, pl.ds(PAD + HW, PAD)] = jnp.zeros((C_in, PAD), jnp.float32)
    hpad_ref[:, pl.ds(0, PAD)] = jnp.zeros((C_out, PAD), jnp.float32)
    hpad_ref[:, pl.ds(PAD + HW, PAD)] = jnp.zeros((C_out, PAD), jnp.float32)

    # Stage 1: conv1 -> InstanceNorm -> ReLU (intermediate never leaves VMEM).
    xpad_ref[:, pl.ds(PAD, HW)] = x_ref[0].astype(jnp.float32)
    h = _conv3x3_in_relu_stage(xpad_ref, w1_ref, not_left, not_right, HW, W, PAD)

    # Stage 2: conv2 -> InstanceNorm -> ReLU, lane-dense aligned output store.
    hpad_ref[:, pl.ds(PAD, HW)] = h
    y = _conv3x3_in_relu_stage(hpad_ref, w2_ref, not_left, not_right, HW, W, PAD)

    o_ref[0] = y.astype(o_ref.dtype)


def unet_input_conv_pallas(x_nchw, weight1, weight2):
    """unet_input_conv.forward: (Conv3x3 -> InstanceNorm2d -> ReLU) x 2.

    Args:
      x_nchw : (N, C_in, H, W) float32
      weight1: (C_out, C_in, 3, 3) float32 (PyTorch OIHW, bias=False)
      weight2: (C_out, C_out, 3, 3) float32 (PyTorch OIHW, bias=False)
    Returns:
      (N, C_out, H, W) float32
    """
    N, C_in, H, W = x_nchw.shape
    C_out = weight1.shape[0]
    assert weight1.shape == (C_out, C_in, 3, 3)
    assert weight2.shape == (C_out, C_out, 3, 3)
    HW = H * W
    PAD = _round_up(W + 1, 128)  # aligned halo; any PAD >= W+1 is correct

    # NCHW -> (N, C, H*W): row-major contiguous, so this is a free bitcast.
    x_flat = x_nchw.reshape(N, C_in, HW)

    # OIHW -> tap-major (ki*3+kj, O, I) weight tiles for the in-kernel matmuls.
    w1_t = jnp.transpose(weight1, (2, 3, 0, 1)).reshape(9, C_out, C_in)
    w2_t = jnp.transpose(weight2, (2, 3, 0, 1)).reshape(9, C_out, C_out)
    w1_t = w1_t.astype(jnp.float32)
    w2_t = w2_t.astype(jnp.float32)

    # Size the scoped VMEM limit from the shapes (default scoped limit differs
    # per generation: 16/32/32 MiB on v5e/v6e/v7x).
    fbytes = 4
    need = (2 * (C_in + C_out) * HW                      # double-buffered in/out
            + (C_in + C_out) * (HW + 2 * PAD)            # padded scratches
            + 9 * (C_out * C_in + C_out * C_out)) * fbytes
    vmem_limit = int(min(48 << 20, max(need + (4 << 20), 16 << 20)))

    # TODO(synk): for large H*W / channel counts (real UNet, v7x's 64 MiB VMEM),
    # add a second "parallel" grid axis over row strips (1-row halo) and switch
    # InstanceNorm to a two-pass (sum/sumsq then normalize) formulation; the
    # small shapes here fit whole-image per grid step.

    kernel = functools.partial(_double_conv_kernel, H=H, W=W, PAD=PAD)

    out_flat = pl.pallas_call(
        kernel,
        out_shape=jax.ShapeDtypeStruct((N, C_out, HW), x_nchw.dtype),
        grid_spec=pltpu.PrefetchScalarGridSpec(
            num_scalar_prefetch=0,
            grid=(N,),
            in_specs=[
                pl.BlockSpec((1, C_in, HW), lambda n: (n, 0, 0)),
                pl.BlockSpec((9, C_out, C_in), lambda n: (0, 0, 0)),
                pl.BlockSpec((9, C_out, C_out), lambda n: (0, 0, 0)),
            ],
            out_specs=pl.BlockSpec((1, C_out, HW), lambda n: (n, 0, 0)),
            scratch_shapes=[
                pltpu.VMEM((C_in, HW + 2 * PAD), jnp.float32),
                pltpu.VMEM((C_out, HW + 2 * PAD), jnp.float32),
            ],
        ),
        compiler_params=pltpu.CompilerParams(
            dimension_semantics=("parallel",),
            vmem_limit_bytes=vmem_limit,
        ),
    )(x_flat, w1_t, w2_t)

    # (N, C_out, H*W) -> NCHW: free bitcast.
    return out_flat.reshape(N, C_out, H, W)


if __name__ == "__main__":
    batch, in_ch, out_ch, spatial = 2, 4, 8, 16

    key = jax.random.PRNGKey(0)
    kx, k1, k2 = jax.random.split(key, 3)

    x = jax.random.normal(kx, (batch, in_ch, spatial, spatial), dtype=jnp.float32)

    # Deterministic Conv2d-style init: uniform(-b, b), b = 1/sqrt(fan_in).
    b1 = 1.0 / (in_ch * 9) ** 0.5
    w1 = jax.random.uniform(k1, (out_ch, in_ch, 3, 3),
                            minval=-b1, maxval=b1, dtype=jnp.float32)
    b2 = 1.0 / (out_ch * 9) ** 0.5
    w2 = jax.random.uniform(k2, (out_ch, out_ch, 3, 3),
                            minval=-b2, maxval=b2, dtype=jnp.float32)

    out = unet_input_conv_pallas(x, w1, w2)
    out = jax.block_until_ready(out)

    # Plain-JAX reference of the module's forward pass.
    def conv3x3(a, w):
        return jax.lax.conv_general_dilated(
            a, w, window_strides=(1, 1), padding="SAME",
            dimension_numbers=("NCHW", "OIHW", "NCHW"))

    def inst_norm_relu(a):
        mean = jnp.mean(a, axis=(2, 3), keepdims=True)
        var = jnp.mean((a - mean) ** 2, axis=(2, 3), keepdims=True)
        return jnp.maximum((a - mean) * jax.lax.rsqrt(var + 1e-5), 0.0)

    ref = inst_norm_relu(conv3x3(inst_norm_relu(conv3x3(x, w1)), w2))

    assert out.shape == (batch, out_ch, spatial, spatial)
    err = float(jnp.max(jnp.abs(out - ref)))
    assert err < 2e-4, err

    print("KERNEL_OK")
</pallas_src>

<mosaic_0001>
module attributes {stable_mosaic.version = 11 : i64} {
  func.func @_double_conv_kernel(%arg0: i32, %arg1: memref<1x4x256xf32, #tpu.memory_space<vmem>>, %arg2: memref<9x8x4xf32, #tpu.memory_space<vmem>>, %arg3: memref<9x8x8xf32, #tpu.memory_space<vmem>>, %arg4: memref<1x8x256xf32, #tpu.memory_space<vmem>>, %arg5: memref<4x512xf32, #tpu.memory_space<vmem>>, %arg6: memref<8x512xf32, #tpu.memory_space<vmem>>) attributes {dimension_semantics = [#tpu.dimension_semantics<parallel>], iteration_bounds = array<i64: 2>, scalar_prefetch = 0 : i64, scratch_operands = 2 : i64, tpu.core_type = #tpu.core_type<tc>, window_params = [{transform_indices = @transform_0, window_bounds = array<i64: 1, 4, 256>}, {pipeline_mode = #tpu.pipeline_mode<synchronous>, transform_indices = @transform_1, window_bounds = array<i64: 9, 8, 4>}, {pipeline_mode = #tpu.pipeline_mode<synchronous>, transform_indices = @transform_2, window_bounds = array<i64: 9, 8, 8>}, {transform_indices = @transform_3, window_bounds = array<i64: 1, 8, 256>}]} {
    %0 = tpu.iota {dimensions = array<i32: 1>} : vector<1x256xi32>
    %c16_i32 = arith.constant 16 : i32
    %c0_i32 = arith.constant 0 : i32
    %1 = arith.cmpi eq, %c16_i32, %c0_i32 : i32
    %c1_i32 = arith.constant 1 : i32
    %2 = arith.select %1, %c1_i32, %c16_i32 : i32
    %3 = vector.broadcast %2 : i32 to vector<1x256xi32>
    %4 = arith.remsi %0, %3 : vector<1x256xi32>
    %c0_i32_0 = arith.constant 0 : i32
    %5 = vector.broadcast %c0_i32_0 : i32 to vector<1x256xi32>
    %6 = arith.cmpi ne, %4, %5 : vector<1x256xi32>
    %c0_i32_1 = arith.constant 0 : i32
    %7 = vector.broadcast %c0_i32_1 : i32 to vector<1x256xi32>
    %8 = arith.cmpi slt, %4, %7 : vector<1x256xi32>
    %c0_i32_2 = arith.constant 0 : i32
    %9 = arith.cmpi slt, %2, %c0_i32_2 : i32
    %10 = vector.broadcast %9 : i1 to vector<1x256xi1>
    %11 = vector.broadcast %10 : vector<1x256xi1> to vector<1x256xi1>
    %12 = arith.xori %8, %11 : vector<1x256xi1>
    %13 = arith.andi %12, %6 : vector<1x256xi1>
    %14 = vector.broadcast %2 : i32 to vector<1x256xi32>
    %15 = arith.addi %4, %14 : vector<1x256xi32>
    %16 = arith.select %13, %15, %4 : vector<1x256xi1>, vector<1x256xi32>
    %c1_i32_3 = arith.constant 1 : i32
    %17 = vector.broadcast %c1_i32_3 : i32 to vector<1x256xi32>
    %18 = arith.cmpi sge, %16, %17 : vector<1x256xi32>
    %c15_i32 = arith.constant 15 : i32
    %19 = vector.broadcast %c15_i32 : i32 to vector<1x256xi32>
    %20 = arith.cmpi slt, %16, %19 : vector<1x256xi32>
    %cst = arith.constant 0.000000e+00 : f32
    %21 = vector.broadcast %cst : f32 to vector<4x128xf32>
    %c0 = arith.constant 0 : index
    %c0_4 = arith.constant 0 : index
    %22 = vector.load %arg5[%c0, %c0_4] : memref<4x512xf32, #tpu.memory_space<vmem>>, vector<4x128xf32>
    tpu.vector_store %arg5[%c0, %c0_4], %21 {strides = array<i32>} : memref<4x512xf32, #tpu.memory_space<vmem>>, vector<4x128xf32>,
    %cst_5 = arith.constant 0.000000e+00 : f32
    %23 = vector.broadcast %cst_5 : f32 to vector<4x128xf32>
    %c0_6 = arith.constant 0 : index
    %c384 = arith.constant 384 : index
    %24 = vector.load %arg5[%c0_6, %c384] : memref<4x512xf32, #tpu.memory_space<vmem>>, vector<4x128xf32>
    tpu.vector_store %arg5[%c0_6, %c384], %23 {strides = array<i32>} : memref<4x512xf32, #tpu.memory_space<vmem>>, vector<4x128xf32>,
    %cst_7 = arith.constant 0.000000e+00 : f32
    %25 = vector.broadcast %cst_7 : f32 to vector<8x128xf32>
    %c0_8 = arith.constant 0 : index
    %c0_9 = arith.constant 0 : index
    %26 = vector.load %arg6[%c0_8, %c0_9] : memref<8x512xf32, #tpu.memory_space<vmem>>, vector<8x128xf32>
    tpu.vector_store %arg6[%c0_8, %c0_9], %25 {strides = array<i32>} : memref<8x512xf32, #tpu.memory_space<vmem>>, vector<8x128xf32>,
    %cst_10 = arith.constant 0.000000e+00 : f32
    %27 = vector.broadcast %cst_10 : f32 to vector<8x128xf32>
    %c0_11 = arith.constant 0 : index
    %c384_12 = arith.constant 384 : index
    %28 = vector.load %arg6[%c0_11, %c384_12] : memref<8x512xf32, #tpu.memory_space<vmem>>, vector<8x128xf32>
    tpu.vector_store %arg6[%c0_11, %c384_12], %27 {strides = array<i32>} : memref<8x512xf32, #tpu.memory_space<vmem>>, vector<8x128xf32>,
    %c0_13 = arith.constant 0 : index
    %c0_14 = arith.constant 0 : index
    %c0_15 = arith.constant 0 : index
    %29 = vector.load %arg1[%c0_13, %c0_14, %c0_15] : memref<1x4x256xf32, #tpu.memory_space<vmem>>, vector<1x4x256xf32>
    %30 = vector.shape_cast %29 : vector<1x4x256xf32> to vector<4x256xf32>
    %c0_16 = arith.constant 0 : index
    %c128 = arith.constant 128 : index
    %31 = vector.load %arg5[%c0_16, %c128] : memref<4x512xf32, #tpu.memory_space<vmem>>, vector<4x256xf32>
    tpu.vector_store %arg5[%c0_16, %c128], %30 {strides = array<i32>} : memref<4x512xf32, #tpu.memory_space<vmem>>, vector<4x256xf32>,
    %c0_17 = arith.constant 0 : index
    %c111 = arith.constant 111 : index
    %32 = vector.load %arg5[%c0_17, %c111] : memref<4x512xf32, #tpu.memory_space<vmem>>, vector<4x256xf32>
    %c0_18 = arith.constant 0 : index
    %c0_19 = arith.constant 0 : index
    %c0_20 = arith.constant 0 : index
    %33 = vector.load %arg2[%c0_18, %c0_19, %c0_20] : memref<9x8x4xf32, #tpu.memory_space<vmem>>, vector<1x8x4xf32>
    %34 = vector.shape_cast %33 : vector<1x8x4xf32> to vector<8x4xf32>
    %cst_21 = arith.constant dense<0.000000e+00> : vector<8x256xf32>
    %35 = tpu.matmul %34, %32, %cst_21 {dimension_numbers = #tpu.dot_dimension_numbers<[1], [0], [0], [1], [0, 0, 1, 1], [], []>, precision = #tpu.contract_precision<fp32>} : vector<8x4xf32>, vector<4x256xf32>, vector<8x256xf32> -> vector<8x256xf32>
    %c0_22 = arith.constant 0 : index
    %c127 = arith.constant 127 : index
    %36 = vector.load %arg5[%c0_22, %c127] : memref<4x512xf32, #tpu.memory_space<vmem>>, vector<4x256xf32>
    %c3 = arith.constant 3 : index
    %c0_23 = arith.constant 0 : index
    %c0_24 = arith.constant 0 : index
    %37 = vector.load %arg2[%c3, %c0_23, %c0_24] : memref<9x8x4xf32, #tpu.memory_space<vmem>>, vector<1x8x4xf32>
    %38 = vector.shape_cast %37 : vector<1x8x4xf32> to vector<8x4xf32>
    %cst_25 = arith.constant dense<0.000000e+00> : vector<8x256xf32>
    %39 = tpu.matmul %38, %36, %cst_25 {dimension_numbers = #tpu.dot_dimension_numbers<[1], [0], [0], [1], [0, 0, 1, 1], [], []>, precision = #tpu.contract_precision<fp32>} : vector<8x4xf32>, vector<4x256xf32>, vector<8x256xf32> -> vector<8x256xf32>
    %40 = arith.addf %35, %39 : vector<8x256xf32>
    %c0_26 = arith.constant 0 : index
    %c143 = arith.constant 143 : index
    %41 = vector.load %arg5[%c0_26, %c143] : memref<4x512xf32, #tpu.memory_space<vmem>>, vector<4x256xf32>
    %c6 = arith.constant 6 : index
    %c0_27 = arith.constant 0 : index
    %c0_28 = arith.constant 0 : index
    %42 = vector.load %arg2[%c6, %c0_27, %c0_28] : memref<9x8x4xf32, #tpu.memory_space<vmem>>, vector<1x8x4xf32>
    %43 = vector.shape_cast %42 : vector<1x8x4xf32> to vector<8x4xf32>
    %cst_29 = arith.constant dense<0.000000e+00> : vector<8x256xf32>
    %44 = tpu.matmul %43, %41, %cst_29 {dimension_numbers = #tpu.dot_dimension_numbers<[1], [0], [0], [1], [0, 0, 1, 1], [], []>, precision = #tpu.contract_precision<fp32>} : vector<8x4xf32>, vector<4x256xf32>, vector<8x256xf32> -> vector<8x256xf32>
    %45 = arith.addf %40, %44 : vector<8x256xf32>
    %cst_30 = arith.constant 0.000000e+00 : f32
    %46 = vector.shape_cast %18 : vector<1x256xi1> to vector<1x256xi1>
    %47 = vector.broadcast %46 : vector<1x256xi1> to vector<8x256xi1>
    %48 = vector.broadcast %cst_30 : f32 to vector<8x256xf32>
    %49 = arith.select %47, %45, %48 : vector<8x256xi1>, vector<8x256xf32>
    %c0_31 = arith.constant 0 : index
    %c112 = arith.constant 112 : index
    %50 = vector.load %arg5[%c0_31, %c112] : memref<4x512xf32, #tpu.memory_space<vmem>>, vector<4x256xf32>
    %c1 = arith.constant 1 : index
    %c0_32 = arith.constant 0 : index
    %c0_33 = arith.constant 0 : index
    %51 = vector.load %arg2[%c1, %c0_32, %c0_33] : memref<9x8x4xf32, #tpu.memory_space<vmem>>, vector<1x8x4xf32>
    %52 = vector.shape_cast %51 : vector<1x8x4xf32> to vector<8x4xf32>
    %cst_34 = arith.constant dense<0.000000e+00> : vector<8x256xf32>
    %53 = tpu.matmul %52, %50, %cst_34 {dimension_numbers = #tpu.dot_dimension_numbers<[1], [0], [0], [1], [0, 0, 1, 1], [], []>, precision = #tpu.contract_precision<fp32>} : vector<8x4xf32>, vector<4x256xf32>, vector<8x256xf32> -> vector<8x256xf32>
    %c0_35 = arith.constant 0 : index
    %c128_36 = arith.constant 128 : index
    %54 = vector.load %arg5[%c0_35, %c128_36] : memref<4x512xf32, #tpu.memory_space<vmem>>, vector<4x256xf32>
    %c4 = arith.constant 4 : index
    %c0_37 = arith.constant 0 : index
    %c0_38 = arith.constant 0 : index
    %55 = vector.load %arg2[%c4, %c0_37, %c0_38] : memref<9x8x4xf32, #tpu.memory_space<vmem>>, vector<1x8x4xf32>
    %56 = vector.shape_cast %55 : vector<1x8x4xf32> to vector<8x4xf32>
    %cst_39 = arith.constant dense<0.000000e+00> : vector<8x256xf32>
    %57 = tpu.matmul %56, %54, %cst_39 {dimension_numbers = #tpu.dot_dimension_numbers<[1], [0], [0], [1], [0, 0, 1, 1], [], []>, precision = #tpu.contract_precision<fp32>} : vector<8x4xf32>, vector<4x256xf32>, vector<8x256xf32> -> vector<8x256xf32>
    %58 = arith.addf %53, %57 : vector<8x256xf32>
    %c0_40 = arith.constant 0 : index
    %c144 = arith.constant 144 : index
    %59 = vector.load %arg5[%c0_40, %c144] : memref<4x512xf32, #tpu.memory_space<vmem>>, vector<4x256xf32>
    %c7 = arith.constant 7 : index
    %c0_41 = arith.constant 0 : index
    %c0_42 = arith.constant 0 : index
    %60 = vector.load %arg2[%c7, %c0_41, %c0_42] : memref<9x8x4xf32, #tpu.memory_space<vmem>>, vector<1x8x4xf32>
    %61 = vector.shape_cast %60 : vector<1x8x4xf32> to vector<8x4xf32>
    %cst_43 = arith.constant dense<0.000000e+00> : vector<8x256xf32>
    %62 = tpu.matmul %61, %59, %cst_43 {dimension_numbers = #tpu.dot_dimension_numbers<[1], [0], [0], [1], [0, 0, 1, 1], [], []>, precision = #tpu.contract_precision<fp32>} : vector<8x4xf32>, vector<4x256xf32>, vector<8x256xf32> -> vector<8x256xf32>
    %63 = arith.addf %58, %62 : vector<8x256xf32>
    %64 = arith.addf %49, %63 : vector<8x256xf32>
    %c0_44 = arith.constant 0 : index
    %c113 = arith.constant 113 : index
    %65 = vector.load %arg5[%c0_44, %c113] : memref<4x512xf32, #tpu.memory_space<vmem>>, vector<4x256xf32>
    %c2 = arith.constant 2 : index
    %c0_45 = arith.constant 0 : index
    %c0_46 = arith.constant 0 : index
    %66 = vector.load %arg2[%c2, %c0_45, %c0_46] : memref<9x8x4xf32, #tpu.memory_space<vmem>>, vector<1x8x4xf32>
    %67 = vector.shape_cast %66 : vector<1x8x4xf32> to vector<8x4xf32>
    %cst_47 = arith.constant dense<0.000000e+00> : vector<8x256xf32>
    %68 = tpu.matmul %67, %65, %cst_47 {dimension_numbers = #tpu.dot_dimension_numbers<[1], [0], [0], [1], [0, 0, 1, 1], [], []>, precision = #tpu.contract_precision<fp32>} : vector<8x4xf32>, vector<4x256xf32>, vector<8x256xf32> -> vector<8x256xf32>
    %c0_48 = arith.constant 0 : index
    %c129 = arith.constant 129 : index
    %69 = vector.load %arg5[%c0_48, %c129] : memref<4x512xf32, #tpu.memory_space<vmem>>, vector<4x256xf32>
    %c5 = arith.constant 5 : index
    %c0_49 = arith.constant 0 : index
    %c0_50 = arith.constant 0 : index
    %70 = vector.load %arg2[%c5, %c0_49, %c0_50] : memref<9x8x4xf32, #tpu.memory_space<vmem>>, vector<1x8x4xf32>
    %71 = vector.shape_cast %70 : vector<1x8x4xf32> to vector<8x4xf32>
    %cst_51 = arith.constant dense<0.000000e+00> : vector<8x256xf32>
    %72 = tpu.matmul %71, %69, %cst_51 {dimension_numbers = #tpu.dot_dimension_numbers<[1], [0], [0], [1], [0, 0, 1, 1], [], []>, precision = #tpu.contract_precision<fp32>} : vector<8x4xf32>, vector<4x256xf32>, vector<8x256xf32> -> vector<8x256xf32>
    %73 = arith.addf %68, %72 : vector<8x256xf32>
    %c0_52 = arith.constant 0 : index
    %c145 = arith.constant 145 : index
    %74 = vector.load %arg5[%c0_52, %c145] : memref<4x512xf32, #tpu.memory_space<vmem>>, vector<4x256xf32>
    %c8 = arith.constant 8 : index
    %c0_53 = arith.constant 0 : index
    %c0_54 = arith.constant 0 : index
    %75 = vector.load %arg2[%c8, %c0_53, %c0_54] : memref<9x8x4xf32, #tpu.memory_space<vmem>>, vector<1x8x4xf32>
    %76 = vector.shape_cast %75 : vector<1x8x4xf32> to vector<8x4xf32>
    %cst_55 = arith.constant dense<0.000000e+00> : vector<8x256xf32>
    %77 = tpu.matmul %76, %74, %cst_55 {dimension_numbers = #tpu.dot_dimension_numbers<[1], [0], [0], [1], [0, 0, 1, 1], [], []>, precision = #tpu.contract_precision<fp32>} : vector<8x4xf32>, vector<4x256xf32>, vector<8x256xf32> -> vector<8x256xf32>
    %78 = arith.addf %73, %77 : vector<8x256xf32>
    %cst_56 = arith.constant 0.000000e+00 : f32
    %79 = vector.shape_cast %20 : vector<1x256xi1> to vector<1x256xi1>
    %80 = vector.broadcast %79 : vector<1x256xi1> to vector<8x256xi1>
    %81 = vector.broadcast %cst_56 : f32 to vector<8x256xf32>
    %82 = arith.select %80, %78, %81 : vector<8x256xi1>, vector<8x256xf32>
    %83 = arith.addf %64, %82 : vector<8x256xf32>
    %cst_57 = arith.constant dense<0.000000e+00> : vector<8xf32>
    %84 = vector.multi_reduction <add>, %83, %cst_57 [1] : vector<8x256xf32> to vector<8xf32>
    %85 = vector.shape_cast %84 : vector<8xf32> to vector<8x1xf32>
    %cst_58 = arith.constant 2.560000e+02 : f32
    %86 = vector.broadcast %cst_58 : f32 to vector<8x1xf32>
    %87 = arith.divf %85, %86 : vector<8x1xf32>
    %88 = vector.broadcast %87 : vector<8x1xf32> to vector<8x256xf32>
    %89 = arith.subf %83, %88 : vector<8x256xf32>
    %90 = arith.mulf %89, %89 : vector<8x256xf32>
    %cst_59 = arith.constant dense<0.000000e+00> : vector<8xf32>
    %91 = vector.multi_reduction <add>, %90, %cst_59 [1] : vector<8x256xf32> to vector<8xf32>
    %92 = vector.shape_cast %91 : vector<8xf32> to vector<8x1xf32>
    %cst_60 = arith.constant 2.560000e+02 : f32
    %93 = vector.broadcast %cst_60 : f32 to vector<8x1xf32>
    %94 = arith.divf %92, %93 : vector<8x1xf32>
    %cst_61 = arith.constant 9.99999974E-6 : f32
    %95 = vector.broadcast %cst_61 : f32 to vector<8x1xf32>
    %96 = arith.addf %94, %95 : vector<8x1xf32>
    %97 = math.rsqrt %96 : vector<8x1xf32>
    %98 = vector.broadcast %97 : vector<8x1xf32> to vector<8x256xf32>
    %99 = arith.mulf %89, %98 : vector<8x256xf32>
    %cst_62 = arith.constant 0.000000e+00 : f32
    %100 = vector.broadcast %cst_62 : f32 to vector<8x256xf32>
    %101 = arith.maximumf %99, %100 : vector<8x256xf32>
    %c0_63 = arith.constant 0 : index
    %c128_64 = arith.constant 128 : index
    %102 = vector.load %arg6[%c0_63, %c128_64] : memref<8x512xf32, #tpu.memory_space<vmem>>, vector<8x256xf32>
    tpu.vector_store %arg6[%c0_63, %c128_64], %101 {strides = array<i32>} : memref<8x512xf32, #tpu.memory_space<vmem>>, vector<8x256xf32>,
    %c0_65 = arith.constant 0 : index
    %c111_66 = arith.constant 111 : index
    %103 = vector.load %arg6[%c0_65, %c111_66] : memref<8x512xf32, #tpu.memory_space<vmem>>, vector<8x256xf32>
    %c0_67 = arith.constant 0 : index
    %c0_68 = arith.constant 0 : index
    %c0_69 = arith.constant 0 : index
    %104 = vector.load %arg3[%c0_67, %c0_68, %c0_69] : memref<9x8x8xf32, #tpu.memory_space<vmem>>, vector<1x8x8xf32>
    %105 = vector.shape_cast %104 : vector<1x8x8xf32> to vector<8x8xf32>
    %cst_70 = arith.constant dense<0.000000e+00> : vector<8x256xf32>
    %106 = tpu.matmul %105, %103, %cst_70 {dimension_numbers = #tpu.dot_dimension_numbers<[1], [0], [0], [1], [0, 0, 1, 1], [], []>, precision = #tpu.contract_precision<fp32>} : vector<8x8xf32>, vector<8x256xf32>, vector<8x256xf32> -> vector<8x256xf32>
    %c0_71 = arith.constant 0 : index
    %c127_72 = arith.constant 127 : index
    %107 = vector.load %arg6[%c0_71, %c127_72] : memref<8x512xf32, #tpu.memory_space<vmem>>, vector<8x256xf32>
    %c3_73 = arith.constant 3 : index
    %c0_74 = arith.constant 0 : index
    %c0_75 = arith.constant 0 : index
    %108 = vector.load %arg3[%c3_73, %c0_74, %c0_75] : memref<9x8x8xf32, #tpu.memory_space<vmem>>, vector<1x8x8xf32>
    %109 = vector.shape_cast %108 : vector<1x8x8xf32> to vector<8x8xf32>
    %cst_76 = arith.constant dense<0.000000e+00> : vector<8x256xf32>
    %110 = tpu.matmul %109, %107, %cst_76 {dimension_numbers = #tpu.dot_dimension_numbers<[1], [0], [0], [1], [0, 0, 1, 1], [], []>, precision = #tpu.contract_precision<fp32>} : vector<8x8xf32>, vector<8x256xf32>, vector<8x256xf32> -> vector<8x256xf32>
    %111 = arith.addf %106, %110 : vector<8x256xf32>
    %c0_77 = arith.constant 0 : index
    %c143_78 = arith.constant 143 : index
    %112 = vector.load %arg6[%c0_77, %c143_78] : memref<8x512xf32, #tpu.memory_space<vmem>>, vector<8x256xf32>
    %c6_79 = arith.constant 6 : index
    %c0_80 = arith.constant 0 : index
    %c0_81 = arith.constant 0 : index
    %113 = vector.load %arg3[%c6_79, %c0_80, %c0_81] : memref<9x8x8xf32, #tpu.memory_space<vmem>>, vector<1x8x8xf32>
    %114 = vector.shape_cast %113 : vector<1x8x8xf32> to vector<8x8xf32>
    %cst_82 = arith.constant dense<0.000000e+00> : vector<8x256xf32>
    %115 = tpu.matmul %114, %112, %cst_82 {dimension_numbers = #tpu.dot_dimension_numbers<[1], [0], [0], [1], [0, 0, 1, 1], [], []>, precision = #tpu.contract_precision<fp32>} : vector<8x8xf32>, vector<8x256xf32>, vector<8x256xf32> -> vector<8x256xf32>
    %116 = arith.addf %111, %115 : vector<8x256xf32>
    %cst_83 = arith.constant 0.000000e+00 : f32
    %117 = vector.shape_cast %18 : vector<1x256xi1> to vector<1x256xi1>
    %118 = vector.broadcast %117 : vector<1x256xi1> to vector<8x256xi1>
    %119 = vector.broadcast %cst_83 : f32 to vector<8x256xf32>
    %120 = arith.select %118, %116, %119 : vector<8x256xi1>, vector<8x256xf32>
    %c0_84 = arith.constant 0 : index
    %c112_85 = arith.constant 112 : index
    %121 = vector.load %arg6[%c0_84, %c112_85] : memref<8x512xf32, #tpu.memory_space<vmem>>, vector<8x256xf32>
    %c1_86 = arith.constant 1 : index
    %c0_87 = arith.constant 0 : index
    %c0_88 = arith.constant 0 : index
    %122 = vector.load %arg3[%c1_86, %c0_87, %c0_88] : memref<9x8x8xf32, #tpu.memory_space<vmem>>, vector<1x8x8xf32>
    %123 = vector.shape_cast %122 : vector<1x8x8xf32> to vector<8x8xf32>
    %cst_89 = arith.constant dense<0.000000e+00> : vector<8x256xf32>
    %124 = tpu.matmul %123, %121, %cst_89 {dimension_numbers = #tpu.dot_dimension_numbers<[1], [0], [0], [1], [0, 0, 1, 1], [], []>, precision = #tpu.contract_precision<fp32>} : vector<8x8xf32>, vector<8x256xf32>, vector<8x256xf32> -> vector<8x256xf32>
    %c0_90 = arith.constant 0 : index
    %c128_91 = arith.constant 128 : index
    %125 = vector.load %arg6[%c0_90, %c128_91] : memref<8x512xf32, #tpu.memory_space<vmem>>, vector<8x256xf32>
    %c4_92 = arith.constant 4 : index
    %c0_93 = arith.constant 0 : index
    %c0_94 = arith.constant 0 : index
    %126 = vector.load %arg3[%c4_92, %c0_93, %c0_94] : memref<9x8x8xf32, #tpu.memory_space<vmem>>, vector<1x8x8xf32>
    %127 = vector.shape_cast %126 : vector<1x8x8xf32> to vector<8x8xf32>
    %cst_95 = arith.constant dense<0.000000e+00> : vector<8x256xf32>
    %128 = tpu.matmul %127, %125, %cst_95 {dimension_numbers = #tpu.dot_dimension_numbers<[1], [0], [0], [1], [0, 0, 1, 1], [], []>, precision = #tpu.contract_precision<fp32>} : vector<8x8xf32>, vector<8x256xf32>, vector<8x256xf32> -> vector<8x256xf32>
    %129 = arith.addf %124, %128 : vector<8x256xf32>
    %c0_96 = arith.constant 0 : index
    %c144_97 = arith.constant 144 : index
    %130 = vector.load %arg6[%c0_96, %c144_97] : memref<8x512xf32, #tpu.memory_space<vmem>>, vector<8x256xf32>
    %c7_98 = arith.constant 7 : index
    %c0_99 = arith.constant 0 : index
    %c0_100 = arith.constant 0 : index
    %131 = vector.load %arg3[%c7_98, %c0_99, %c0_100] : memref<9x8x8xf32, #tpu.memory_space<vmem>>, vector<1x8x8xf32>
    %132 = vector.shape_cast %131 : vector<1x8x8xf32> to vector<8x8xf32>
    %cst_101 = arith.constant dense<0.000000e+00> : vector<8x256xf32>
    %133 = tpu.matmul %132, %130, %cst_101 {dimension_numbers = #tpu.dot_dimension_numbers<[1], [0], [0], [1], [0, 0, 1, 1], [], []>, precision = #tpu.contract_precision<fp32>} : vector<8x8xf32>, vector<8x256xf32>, vector<8x256xf32> -> vector<8x256xf32>
    %134 = arith.addf %129, %133 : vector<8x256xf32>
    %135 = arith.addf %120, %134 : vector<8x256xf32>
    %c0_102 = arith.constant 0 : index
    %c113_103 = arith.constant 113 : index
    %136 = vector.load %arg6[%c0_102, %c113_103] : memref<8x512xf32, #tpu.memory_space<vmem>>, vector<8x256xf32>
    %c2_104 = arith.constant 2 : index
    %c0_105 = arith.constant 0 : index
    %c0_106 = arith.constant 0 : index
    %137 = vector.load %arg3[%c2_104, %c0_105, %c0_106] : memref<9x8x8xf32, #tpu.memory_space<vmem>>, vector<1x8x8xf32>
    %138 = vector.shape_cast %137 : vector<1x8x8xf32> to vector<8x8xf32>
    %cst_107 = arith.constant dense<0.000000e+00> : vector<8x256xf32>
    %139 = tpu.matmul %138, %136, %cst_107 {dimension_numbers = #tpu.dot_dimension_numbers<[1], [0], [0], [1], [0, 0, 1, 1], [], []>, precision = #tpu.contract_precision<fp32>} : vector<8x8xf32>, vector<8x256xf32>, vector<8x256xf32> -> vector<8x256xf32>
    %c0_108 = arith.constant 0 : index
    %c129_109 = arith.constant 129 : index
    %140 = vector.load %arg6[%c0_108, %c129_109] : memref<8x512xf32, #tpu.memory_space<vmem>>, vector<8x256xf32>
    %c5_110 = arith.constant 5 : index
    %c0_111 = arith.constant 0 : index
    %c0_112 = arith.constant 0 : index
    %141 = vector.load %arg3[%c5_110, %c0_111, %c0_112] : memref<9x8x8xf32, #tpu.memory_space<vmem>>, vector<1x8x8xf32>
    %142 = vector.shape_cast %141 : vector<1x8x8xf32> to vector<8x8xf32>
    %cst_113 = arith.constant dense<0.000000e+00> : vector<8x256xf32>
    %143 = tpu.matmul %142, %140, %cst_113 {dimension_numbers = #tpu.dot_dimension_numbers<[1], [0], [0], [1], [0, 0, 1, 1], [], []>, precision = #tpu.contract_precision<fp32>} : vector<8x8xf32>, vector<8x256xf32>, vector<8x256xf32> -> vector<8x256xf32>
    %144 = arith.addf %139, %143 : vector<8x256xf32>
    %c0_114 = arith.constant 0 : index
    %c145_115 = arith.constant 145 : index
    %145 = vector.load %arg6[%c0_114, %c145_115] : memref<8x512xf32, #tpu.memory_space<vmem>>, vector<8x256xf32>
    %c8_116 = arith.constant 8 : index
    %c0_117 = arith.constant 0 : index
    %c0_118 = arith.constant 0 : index
    %146 = vector.load %arg3[%c8_116, %c0_117, %c0_118] : memref<9x8x8xf32, #tpu.memory_space<vmem>>, vector<1x8x8xf32>
    %147 = vector.shape_cast %146 : vector<1x8x8xf32> to vector<8x8xf32>
    %cst_119 = arith.constant dense<0.000000e+00> : vector<8x256xf32>
    %148 = tpu.matmul %147, %145, %cst_119 {dimension_numbers = #tpu.dot_dimension_numbers<[1], [0], [0], [1], [0, 0, 1, 1], [], []>, precision = #tpu.contract_precision<fp32>} : vector<8x8xf32>, vector<8x256xf32>, vector<8x256xf32> -> vector<8x256xf32>
    %149 = arith.addf %144, %148 : vector<8x256xf32>
    %cst_120 = arith.constant 0.000000e+00 : f32
    %150 = vector.shape_cast %20 : vector<1x256xi1> to vector<1x256xi1>
    %151 = vector.broadcast %150 : vector<1x256xi1> to vector<8x256xi1>
    %152 = vector.broadcast %cst_120 : f32 to vector<8x256xf32>
    %153 = arith.select %151, %149, %152 : vector<8x256xi1>, vector<8x256xf32>
    %154 = arith.addf %135, %153 : vector<8x256xf32>
    %cst_121 = arith.constant dense<0.000000e+00> : vector<8xf32>
    %155 = vector.multi_reduction <add>, %154, %cst_121 [1] : vector<8x256xf32> to vector<8xf32>
    %156 = vector.shape_cast %155 : vector<8xf32> to vector<8x1xf32>
    %cst_122 = arith.constant 2.560000e+02 : f32
    %157 = vector.broadcast %cst_122 : f32 to vector<8x1xf32>
    %158 = arith.divf %156, %157 : vector<8x1xf32>
    %159 = vector.broadcast %158 : vector<8x1xf32> to vector<8x256xf32>
    %160 = arith.subf %154, %159 : vector<8x256xf32>
    %161 = arith.mulf %160, %160 : vector<8x256xf32>
    %cst_123 = arith.constant dense<0.000000e+00> : vector<8xf32>
    %162 = vector.multi_reduction <add>, %161, %cst_123 [1] : vector<8x256xf32> to vector<8xf32>
    %163 = vector.shape_cast %162 : vector<8xf32> to vector<8x1xf32>
    %cst_124 = arith.constant 2.560000e+02 : f32
    %164 = vector.broadcast %cst_124 : f32 to vector<8x1xf32>
    %165 = arith.divf %163, %164 : vector<8x1xf32>
    %cst_125 = arith.constant 9.99999974E-6 : f32
    %166 = vector.broadcast %cst_125 : f32 to vector<8x1xf32>
    %167 = arith.addf %165, %166 : vector<8x1xf32>
    %168 = math.rsqrt %167 : vector<8x1xf32>
    %169 = vector.broadcast %168 : vector<8x1xf32> to vector<8x256xf32>
    %170 = arith.mulf %160, %169 : vector<8x256xf32>
    %cst_126 = arith.constant 0.000000e+00 : f32
    %171 = vector.broadcast %cst_126 : f32 to vector<8x256xf32>
    %172 = arith.maximumf %170, %171 : vector<8x256xf32>
    %c0_127 = arith.constant 0 : index
    %c0_128 = arith.constant 0 : index
    %c0_129 = arith.constant 0 : index
    %173 = vector.load %arg4[%c0_127, %c0_128, %c0_129] : memref<1x8x256xf32, #tpu.memory_space<vmem>>, vector<1x8x256xf32>
    %174 = vector.shape_cast %173 : vector<1x8x256xf32> to vector<8x256xf32>
    %175 = vector.shape_cast %172 : vector<8x256xf32> to vector<1x8x256xf32>
    tpu.vector_store %arg4[%c0_127, %c0_128, %c0_129], %175 {strides = array<i32>} : memref<1x8x256xf32, #tpu.memory_space<vmem>>, vector<1x8x256xf32>,
    return
  }
  func.func @transform_0(%arg0: i32) -> (i32, i32, i32) {
    %c0_i32 = arith.constant 0 : i32
    %c0_i32_0 = arith.constant 0 : i32
    %c0_i32_1 = arith.constant 0 : i32
    return %arg0, %c0_i32, %c0_i32_0 : i32, i32, i32
  }
  func.func @transform_1(%arg0: i32) -> (i32, i32, i32) {
    %c0_i32 = arith.constant 0 : i32
    %c0_i32_0 = arith.constant 0 : i32
    %c0_i32_1 = arith.constant 0 : i32
    %c0_i32_2 = arith.constant 0 : i32
    return %c0_i32, %c0_i32_0, %c0_i32_1 : i32, i32, i32
  }
  func.func @transform_2(%arg0: i32) -> (i32, i32, i32) {
    %c0_i32 = arith.constant 0 : i32
    %c0_i32_0 = arith.constant 0 : i32
    %c0_i32_1 = arith.constant 0 : i32
    %c0_i32_2 = arith.constant 0 : i32
    return %c0_i32, %c0_i32_0, %c0_i32_1 : i32, i32, i32
  }
  func.func @transform_3(%arg0: i32) -> (i32, i32, i32) {
    %c0_i32 = arith.constant 0 : i32
    %c0_i32_0 = arith.constant 0 : i32
    %c0_i32_1 = arith.constant 0 : i32
    return %arg0, %c0_i32, %c0_i32_0 : i32, i32, i32
  }
}

</mosaic_0001>

<bundles_post_ra>
// kernel: tpu_custom_call.1
= control target key start
LH: loop header
LB: loop body
LE: loop exit
PB: predicated region body
PF: predicated region fallthrough
CT: control target
= control target key end

     0   :  { %8 = vsyncpa [#allocation5], 0  ;;  %s7164_s0 = inlined_call_operand.vmem [shape: f32[2,4,256], index: 0, kind: input, shape index: {}]   ;;  %s7165_s1 = inlined_call_operand.vmem [shape: f32[9,8,4], index: 1, kind: input, shape index: {}]   ;;  %s7166_s2 = inlined_call_operand.vmem [shape: f32[9,8,8], index: 2, kind: input, shape index: {}]   ;;  %s7167_s3 = inlined_call_operand.hbm [shape: f32[2,8,256], index: 3, kind: output, shape index: {}]  }
   0x1   :  { %10 = vsyncpa [#allocation5 + $0x1], 0  ;;  %s6190_s12 = smov 0   ;;  %s6192_s13 = smov 0  }
   0x2   :  { %s6194_s14 = smov 0   ;;  %s6196_s15 = smov 0  }
   0x3 LB: > { %s6211_s16 = sadd.s32 4294967295, %s6158_s15   ;;  %s6011_s17 = sadd.s32 4294967294, %s6158_s15   ;;  %s6158_s15 = sphi %s6196_s15, %s7246_s15   ;;  %s6154_s14 = sphi %s6194_s14, %s7245_s14   ;;  %s6150_s13 = sphi %s6192_s13, %s7244_s13   ;;  %s6146_s12 = sphi %s6190_s12, %s7243_s12  }
   0x4   : > { %s6215_s18 = sadd.s32 1, %s6158_s15   ;;  %s91_s19 = sadd.s32 1, %s6154_s14 }
   0x5   : > { %s88_s20 = ssub.s32 %s6158_s15, %s6215_s18  ;;  %p101_p0 = scmp.ne.s32.totalorder %s6154_s14, %s6150_s13 }
   0x6   : > { %p89_p1 = scmp.eq.s32.totalorder %s88_s20, 0  ;;  %p102_p2 = scmp.eq.s32.totalorder %s6211_s16, 1 }
   0x7   : > { %p107_p3 = scmp.ne.s32.totalorder %s6150_s13, %s6146_s12  ;;  %p108_p4 = scmp.eq.s32.totalorder %s6011_s17, 1 }
   0x8   : > { %s6226_s21 = scalar_select %p89_p1, %s6154_s14, %s91_s19  }
   0x9   : > { %p6228_p5 = por %p102_p2, %p101_p0  ;;  %p6232_p6 = por %p108_p4, %p107_p3 }
   0xa   : > { %p6014_p7 = scmp.ge.s32.totalorder %s6158_s15, 1  ;;  %p140_p8 = scmp.lt.s32.totalorder %s6158_s15, 3 }
   0xc   : > { %p141_p9 = pnand %p6014_p7, %p140_p8 }
   0xe   : > { %144 = sbr.rel (%p141_p9) target bundleno = 1514 (0x5ea), region = 32 }
  0x13   : > { %p164_p10 = scmp.lt.s32.totalorder %s6211_s16, 1  ;;  %v7168_v0 = vmov 0.0   ;;  %s6161_s29 = smov 1   ;;  %v6018_v23 = vld [vmem:[%s7165_s1 + $0x18] sm:$0xff]  ;;  %vm228_vm0 = vcmask 31744   ;;  %vm541_vm1 = vcmask 138240  }
  0x14   : > { %200 = vst [vmem:[#allocation2] sm:$0xf] %v7168_v0  ;;  %s6162_s30 = smov 17   ;;  %s6163_s4 = smov 113   ;;  %v230_v24 = vsel %vm228_vm0, %v6018_v23, 0  ;;  %vm225_vm2 = vcmask 7168  }
  0x15   : > { %s165_s24 = scalar_select %p164_p10, %s6211_s16, 1  ;;  %201 = vst [vmem:[#allocation2 + $0xc] sm:$0xf] %v7168_v0  ;;  %v6279_v26 = vand.u32 4294901760, %v230_v24  ;;  %vm232_vm3 = vcmask 1043456   ;;  %v208_v52 = vld [vmem:[%s7165_s1] sm:$0xff] }
  0x16   : > { %s6164_s5 = smov 16   ;;  %s6165_s6 = smov 112   ;;  %v545_v58 = vsel %vm228_vm0, %v208_v52, 0  ;;  %vm861_vm4 = vcmask 924672   ;;  %vm1495_vm5 = vcmask 130048   ;;  %vm1815_vm6 = vcmask 916480  }
  0x17   : > { %s6039_s25 = sshll.u32 %s165_s24, 3  ;;  %v6282_v27 = vsub.f32 %v230_v24, %v6279_v26  ;;  %s6166_s9 = smov 127   ;;  %vm2143_vm7 = vcmask 1039360   ;;  %vm2459_vm8 = vcmask 121856   ;;  %vm2779_vm9 = vcmask 908288  }
  0x18   : > { %s168_s28 = scalar_lea.vmem %s7164_s0, %s6039_s25  ;;  %s6167_s17 = smov 15  }
  0x19   : > { %v6245_v1 = vld [vmem:[%s168_s28] sm:$0xff]  ;;  %v6287_v34 = vand.u32 4294901760, %v6282_v27  ;;  %s6168_s24 = smov 111   ;;  %s6116_s11 = scalar_lea.hbm %s7167_s3, 32 }
  0x1a   : > { %205 = vst [vmem:[#allocation2 + $0x4] sm:$0xff] %v6245_v1 }
  0x1b   : > { %v257_v36 = vsub.f32 %v6282_v27, %v6287_v34 }
  0x1c   : > { %v844_v7 = vld [vmem:[#allocation2 + $0xc] sm:$0xf] }
  0x1d   : > { %v1798_v20 = vld [vmem:[#allocation2 + $0xc] sm:$0xf]  ;;  %v258_v45 = vand.u32 4294901760, %v257_v36 }
  0x1e   : > { %v2126_v29 = vld [vmem:[#allocation2 + $0xc] sm:$0xf] }
  0x21   : > { %v6248_v2 = vld [vmem:[#allocation2] sm:$0xff]  ;;  %v207_v3 = vld [vmem:[#allocation2 + $0x8] sm:$0xf] }
  0x22   : > { %213 = vst [vmem:[#allocation1] ss:$2 sm:$0xff] %v6248_v2  ;;  %v1172_v11 = vld [vmem:[#allocation2 + $0x8] sm:$0xf] }
  0x23   : > { %215 = vst [vmem:[#allocation1 + $0x10] ss:$2 sm:$0xff] %v207_v3  ;;  %v2122_v62 = vld [vmem:[#allocation2 + $0x8] sm:$0xf] }
  0x29   : > { %v216_v4 = vld.sshfl [vmem:[#allocation1] sm:$0xff pattern:$0x75316420]  ;;  %v217_v5 = vld.sshfl [vmem:[#allocation1 + $0x8] sm:$0xff pattern:$0x75316420] }
  0x2a   : > { %219 = vrot.lane.b32.xlu0 %v216_v4, %s6161_s29  ;;  %v218_v6 = vld.sshfl [vmem:[#allocation1 + $0x10] sm:$0xff pattern:$0x75316420]  ;;  %529 = vst [vmem:[#allocation1] ss:$2 sm:$0xff] %v6248_v2 }
  0x2b   : > { %223 = vrot.lane.b32.xlu1 %v218_v6, %s6161_s29  ;;  %531 = vst [vmem:[#allocation1 + $0x10] ss:$2 sm:$0xff] %v207_v3 }
  0x31   : > { %v532_v8 = vld.sshfl [vmem:[#allocation1] sm:$0xff pattern:$0x75316420]  ;;  %v533_v9 = vld.sshfl [vmem:[#allocation1 + $0x8] sm:$0xff pattern:$0x75316420] }
  0x32   : > { %221 = vrot.lane.b32.xlu0 %v217_v5, %s6161_s29  ;;  %537 = vrot.lane.b32.xlu2 %v533_v9, %s6162_s30  ;;  %849 = vst [vmem:[#allocation1] ss:$2 sm:$0xff] %v6245_v1  ;;  %v534_v10 = vld.sshfl [vmem:[#allocation1 + $0x10] sm:$0xff pattern:$0x75316420] }
  0x33   : > { %535 = vrot.lane.b32.xlu1 %v532_v8, %s6162_s30  ;;  %851 = vst [vmem:[#allocation1 + $0x10] ss:$2 sm:$0xff] %v844_v7 }
  0x39   : > { %v853_v12 = vld.sshfl [vmem:[#allocation1 + $0x8] sm:$0xff pattern:$0x75316420]  ;;  %v852_v13 = vld.sshfl [vmem:[#allocation1] sm:$0xff pattern:$0x75316420] }
  0x3a   : > { %539 = vrot.lane.b32.xlu2 %v534_v10, %s6162_s30  ;;  %855 = vrot.lane.b32.xlu0 %v852_v13, %s6163_s4  ;;  %1179 = vst [vmem:[#allocation1] ss:$2 sm:$0xff] %v6245_v1  ;;  %v854_v14 = vld.sshfl [vmem:[#allocation1 + $0x10] sm:$0xff pattern:$0x75316420] }
  0x3b   : > { %857 = vrot.lane.b32.xlu1 %v853_v12, %s6163_s4  ;;  %1485 = vst [vmem:[#allocation1 + $0x10] ss:$2 sm:$0xff] %v1172_v11 }
  0x41   : > { %v6262_v15 = vld.sshfl [vmem:[#allocation1] sm:$0xff pattern:$0x75316420]  ;;  %v6264_v16 = vld.sshfl [vmem:[#allocation1 + $0x8] sm:$0xff pattern:$0x75316420] }
  0x42   : > { %1483 = vst [vmem:[#allocation1] ss:$2 sm:$0xff] %v6248_v2  ;;  %859 = vrot.lane.b32.xlu2 %v854_v14, %s6163_s4  ;;  %v1488_v19 = vld.sshfl [vmem:[#allocation1 + $0x10] sm:$0xff pattern:$0x75316420] }
  0x43   : > { %1805 = vst [vmem:[#allocation1 + $0x10] ss:$2 sm:$0xff] %v1798_v20 }
  0x49   : > { %v1487_v17 = vld.sshfl [vmem:[#allocation1 + $0x8] sm:$0xff pattern:$0x75316420]  ;;  %v1486_v18 = vld.sshfl [vmem:[#allocation1] sm:$0xff pattern:$0x75316420] }
  0x4a   : > { %1491 = vrot.lane.b32.xlu1 %v1487_v17, %s6164_s5  ;;  %1489 = vrot.lane.b32.xlu0 %v1486_v18, %s6164_s5  ;;  %1803 = vst [vmem:[#allocation1] ss:$2 sm:$0xff] %v6245_v1  ;;  %v1808_v28 = vld.sshfl [vmem:[#allocation1 + $0x10] sm:$0xff pattern:$0x75316420] }
  0x4b   : > { %1493 = vrot.lane.b32.xlu2 %v1488_v19, %s6164_s5  ;;  %2133 = vst [vmem:[#allocation1 + $0x10] ss:$2 sm:$0xff] %v2126_v29 }
  0x51   : > { %v1807_v21 = vld.sshfl [vmem:[#allocation1 + $0x8] sm:$0xff pattern:$0x75316420]  ;;  %v1806_v22 = vld.sshfl [vmem:[#allocation1] sm:$0xff pattern:$0x75316420] }
  0x52   : > { %1811 = vrot.lane.b32.xlu1 %v1807_v21, %s6165_s6  ;;  %1809 = vrot.lane.b32.xlu0 %v1806_v22, %s6165_s6  ;;  %2131 = vst [vmem:[#allocation1] ss:$2 sm:$0xff] %v6245_v1  ;;  %v2136_v63 = vld.sshfl [vmem:[#allocation1 + $0x10] sm:$0xff pattern:$0x75316420] }
  0x53   : > { %1813 = vrot.lane.b32.xlu2 %v1808_v28, %s6165_s6  ;;  %2449 = vst [vmem:[#allocation1 + $0x10] ss:$2 sm:$0xff] %v2122_v62  ;;  %v6019_v28 = vld [vmem:[%s7165_s1 + $0x30] sm:$0xff] }
  0x54   : > { %v865_v29 = vsel %vm228_vm0, %v6019_v28, 0 }
  0x59   : > { %v2135_v31 = vld.sshfl [vmem:[#allocation1 + $0x8] sm:$0xff pattern:$0x75316420]  ;;  %v2134_v33 = vld.sshfl [vmem:[#allocation1] sm:$0xff pattern:$0x75316420] }
  0x5a   : > { %2139 = vrot.lane.b32.xlu1 %v2135_v31, %s6166_s9  ;;  %2137 = vrot.lane.b32.xlu0 %v2134_v33, %s6166_s9  ;;  %2447 = vst [vmem:[#allocation1] ss:$2 sm:$0xff] %v6248_v2  ;;  %v6315_v2 = vand.u32 4294901760, %v545_v58  ;;  %v2452_v31 = vld.sshfl [vmem:[#allocation1 + $0x10] sm:$0xff pattern:$0x75316420] }
  0x5b   : > { %2141 = vrot.lane.b32.xlu2 %v2136_v63, %s6166_s9  ;;  %v6358_v33 = vand.u32 4294901760, %v865_v29 }
  0x5c   : > { %v6322_v7 = vsub.f32 %v545_v58, %v6315_v2 }
  0x5d   : > { %v6364_v36 = vsub.f32 %v865_v29, %v6358_v33 }
  0x5e   : > { %v6330_v12 = vand.u32 4294901760, %v6322_v7 }
  0x60   : > { %v571_v20 = vsub.f32 %v6322_v7, %v6330_v12 }
  0x61   : > { %v2451_v9 = vld.sshfl [vmem:[#allocation1 + $0x8] sm:$0xff pattern:$0x75316420]  ;;  %v2450_v10 = vld.sshfl [vmem:[#allocation1] sm:$0xff pattern:$0x75316420] }
  0x62   : > { %2767 = vst [vmem:[#allocation1] ss:$2 sm:$0xff] %v6245_v1  ;;  %2455 = vrot.lane.b32.xlu1 %v2451_v9, %s6167_s17  ;;  %2453 = vrot.lane.b32.xlu0 %v2450_v10, %s6167_s17  ;;  %v572_v24 = vand.u32 4294901760, %v571_v20 }
  0x63   : > { %2457 = vrot.lane.b32.xlu2 %v2452_v31, %s6167_s17 }
  0x8c   : > { %v538_v25 = vpop.permute.xlu2 %537 }
  0x94   : > { %v540_v35 = vpop.permute.xlu2 %539 }
  0x95   : > { %v543_v37 = vsel %vm541_vm1, %v538_v25, %v540_v35 }
  0x96   : > { %v549_v41 = vsel %vm232_vm3, %v543_v37, 0 }
  0x97   : > { %v6301_v50 = vand.u32 4294901760, %v549_v41 }
  0x99   : > { %v6313_v59 = vsub.f32 %v549_v41, %v6301_v50  ;;  %v6370_v41 = vand.u32 4294901760, %v6364_v36 }
  0x9b   : > { %v740_v6 = vand.u32 4294901760, %v6313_v59 }
  0x9c   : > { %v220_v30 = vpop.permute.xlu0 %219  ;;  %v860_v18 = vpop.permute.xlu2 %859 }
  0x9d   : > { %v224_v32 = vpop.permute.xlu1 %223  ;;  %v741_v11 = vsub.f32 %v6313_v59, %v740_v6 }
  0x9f   : > { %v742_v1 = vand.u32 4294901760, %v741_v11  ;;  %v6020_v11 = vld [vmem:[%s7165_s1 + $0x8] sm:$0xff] }
  0xa4   : > { %v222_v38 = vpop.permute.xlu0 %221 }
  0xa5   : > { %v226_v39 = vsel %vm225_vm2, %v220_v30, %v222_v38  ;;  %v227_v40 = vsel %vm225_vm2, %v222_v38, %v224_v32  ;;  %v536_v42 = vpop.permute.xlu1 %535  ;;  %v2762_v32 = vld [vmem:[#allocation2 + $0xc] sm:$0xf]  ;;  %v2771_v38 = vld.sshfl [vmem:[#allocation1 + $0x8] sm:$0xff pattern:$0x75316420]  ;;  %v1494_v63 = vpop.permute.xlu2 %1493 }
  0xa6   : > { %v233_v43 = vsel %vm232_vm3, %v226_v39, 0  ;;  %v235_v44 = vsel %vm232_vm3, %v227_v40, 0  ;;  %v542_v46 = vsel %vm541_vm1, %v536_v42, %v538_v25  ;;  %2769 = vst [vmem:[#allocation1 + $0x10] ss:$2 sm:$0xff] %v2762_v32  ;;  %2775 = vrot.lane.b32.xlu1 %v2771_v38, %s6168_s24 }
  0xa7   : > { %v252_v47 = vand.u32 4294901760, %v233_v43  ;;  %v398_v48 = vand.u32 4294901760, %v235_v44  ;;  %v547_v49 = vsel %vm232_vm3, %v542_v46, 0  ;;  %v2770_v39 = vld.sshfl [vmem:[#allocation1] sm:$0xff pattern:$0x75316420] }
  0xa8   : > { %v6303_v51 = vand.u32 4294901760, %v547_v49  ;;  %2773 = vrot.lane.b32.xlu0 %v2770_v39, %s6168_s24  ;;  %v1187_v46 = vsel %vm232_vm3, %v6264_v16, 0 }
  0xa9   : > { %v279_v53 = vsub.f32 %v233_v43, %v252_v47  ;;  %v425_v54 = vsub.f32 %v235_v44, %v398_v48  ;;  %253 = vmatpush.msra.mxu0 %v252_v47  ;;  %329 = vmatpush.msra.mxu3 %v252_v47  ;;  %v891_v44 = vsub.f32 %v6364_v36, %v6370_v41 }
  0xaa   : > { %259 = vmatmul.f32.vlgmr.msra.gmra.mxu0 %v258_v45  ;;  %333 = vmatmul.f32.vlgmr.msra.gmra.mxu3 %v6287_v34  ;;  %v593_v57 = vsub.f32 %v547_v49, %v6303_v51  ;;  %v6021_v49 = vld [vmem:[%s7165_s1 + $0x20] sm:$0xff] }
  0xab   : > { %306 = vmatpush.msra.mxu2 %v279_v53  ;;  %v280_v55 = vand.u32 4294901760, %v279_v53  ;;  %v426_v56 = vand.u32 4294901760, %v425_v54 }
  0xac   : > { %309 = vmatmul.f32.vlgmr.msra.gmra.mxu2 %v6282_v27  ;;  %v594_v5 = vand.u32 4294901760, %v593_v57  ;;  %v856_v14 = vpop.permute.xlu0 %855 }
  0xad   : > { %399 = vmatpush.msrb.mxu2 %v398_v48  ;;  %355 = vmatpush.msrb.mxu0 %v280_v55  ;;  %v281_v60 = vsub.f32 %v279_v53, %v280_v55  ;;  %v427_v61 = vsub.f32 %v425_v54, %v426_v56  ;;  %v858_v13 = vpop.permute.xlu1 %857  ;;  %v2772_v52 = vld.sshfl [vmem:[#allocation1 + $0x10] sm:$0xff pattern:$0x75316420] }
  0xae   : > { %v595_v8 = vsub.f32 %v593_v57, %v594_v5  ;;  %v862_v19 = vsel %vm861_vm4, %v856_v14, %v858_v13  ;;  %v863_v21 = vsel %vm861_vm4, %v858_v13, %v860_v18  ;;  %2777 = vrot.lane.b32.xlu2 %v2772_v52, %s6168_s24  ;;  %v1499_v13 = vsel %vm228_vm0, %v6020_v11, 0 }
  0xaf   : > { %501 = vmatpush.msra.mxu2 %v426_v56  ;;  %452 = vmatpush.msra.mxu0 %v425_v54  ;;  %v282_v3 = vand.u32 4294901760, %v281_v60  ;;  %v428_v4 = vand.u32 4294901760, %v427_v61  ;;  %v867_v22 = vsel %vm232_vm3, %v862_v19, 0  ;;  %v869_v23 = vsel %vm232_vm3, %v863_v21, 0 }
  0xb0   : > { %v596_v17 = vand.u32 4294901760, %v595_v8  ;;  %v886_v25 = vand.u32 4294901760, %v867_v22 }
  0xb1   : > { %283 = vmatpush.msra.mxu1 %v282_v3  ;;  %429 = vmatpush.msrb.mxu3 %v428_v4 }
  0xb2   : > { %285 = vmatmul.f32.vlgmr.msra.gmra.mxu1 %v6279_v26  ;;  %357 = vmatmul.f32.vlgmr.msrb.gmra.mxu0 %v6279_v26 }
  0xb3   : > { %377 = vmatpush.msrb.mxu1 %v252_v47  ;;  %431 = vmatmul.f32.vlgmr.msrb.gmra.mxu3 %v6279_v26  ;;  %v892_v47 = vand.u32 4294901760, %v891_v44 }
  0xb4   : > { %523 = vmatpush.msra.mxu3 %v398_v48  ;;  %405 = vmatmul.f32.vlgmr.msrb.gmra.mxu2 %v258_v45  ;;  %v1185_v45 = vsel %vm232_vm3, %v6262_v15, 0  ;;  %v1183_v15 = vsel %vm228_vm0, %v6021_v49, 0 }
  0xb5   : > { %475 = vmatpush.msra.mxu1 %v398_v48  ;;  %567 = vmatpush.msrb.mxu0 %v6303_v51  ;;  %v1204_v48 = vand.u32 4294901760, %v1185_v45  ;;  %v6395_v53 = vand.u32 4294901760, %v1183_v15 }
  0xb6   : > { %620 = vmatpush.msrb.mxu2 %v593_v57  ;;  %643 = vmatpush.msrb.mxu3 %v6303_v51 }
  0xb7   : > { %v6401_v56 = vsub.f32 %v1183_v15, %v6395_v53  ;;  %3136 = vrot.lane.b32.xlu2 %v7168_v0, %s6161_s29 }
  0xba   : > { %379 = vmatmul.f32.vlgmr.msrb.gmra.mxu1 %v6279_v26  ;;  %455 = vmatmul.f32.vlgmr.msra.gmra.mxu0 %v6282_v27  ;;  %v6345_v27 = vand.u32 4294901760, %v869_v23 }
  0xbb   : > { %525 = vmatmul.f32.vlgmr.msra.gmra.mxu3 %v6279_v26  ;;  %597 = vmatpush.msrb.mxu1 %v596_v17  ;;  %v6432_v17 = vand.u32 4294901760, %v1499_v13 }
  0xbc   : > { %669 = vmatpush.msra.mxu0 %v594_v5  ;;  %743 = vmatpush.msra.mxu3 %v742_v1  ;;  %v1059_v30 = vsub.f32 %v869_v23, %v6345_v27  ;;  %v1492_v60 = vpop.permute.xlu1 %1491  ;;  %v1490_v61 = vpop.permute.xlu0 %1489 }
  0xbd   : > { %503 = vmatmul.f32.vlgmr.msra.gmra.mxu2 %v6279_v26  ;;  %v913_v26 = vsub.f32 %v867_v22, %v886_v25  ;;  %v1496_v3 = vsel %vm1495_vm5, %v1490_v61, %v1492_v60  ;;  %v1497_v5 = vsel %vm1495_vm5, %v1492_v60, %v1494_v63  ;;  %v6437_v19 = vsub.f32 %v1499_v13, %v6432_v17 }
  0xbe   : > { %713 = vmatpush.msra.mxu2 %v6301_v50  ;;  %v1060_v35 = vand.u32 4294901760, %v1059_v30 }
  0xbf   : > { %v6442_v22 = vand.u32 4294901760, %v6437_v19 }
  0xc0   : > { %v1061_v40 = vsub.f32 %v1059_v30, %v1060_v35 }
  0xc1   : > { %v1525_v29 = vsub.f32 %v6437_v19, %v6442_v22 }
  0xc2   : > { %479 = vmatmul.f32.vlgmr.msra.gmra.mxu1 %v6287_v34  ;;  %573 = vmatmul.f32.vlgmr.msrb.gmra.mxu0 %v572_v24  ;;  %v914_v34 = vand.u32 4294901760, %v913_v26  ;;  %v1062_v43 = vand.u32 4294901760, %v1061_v40 }
  0xc3   : > { %647 = vmatmul.f32.vlgmr.msrb.gmra.mxu3 %v6330_v12  ;;  %691 = vmatpush.msra.mxu1 %v6303_v51  ;;  %v1231_v51 = vsub.f32 %v1185_v45, %v1204_v48 }
  0xc4   : > { %766 = vmatpush.msrb.mxu0 %v6313_v59  ;;  %837 = vmatpush.msrb.mxu3 %v6301_v50  ;;  %v915_v37 = vsub.f32 %v913_v26, %v914_v34  ;;  %v6406_v59 = vand.u32 4294901760, %v6401_v56  ;;  %v1812_v23 = vpop.permute.xlu1 %1811 }
  0xc5   : > { %623 = vmatmul.f32.vlgmr.msrb.gmra.mxu2 %v6322_v7  ;;  %v1232_v54 = vand.u32 4294901760, %v1231_v51 }
  0xc6   : > { %815 = vmatpush.msrb.mxu2 %v740_v6  ;;  %v916_v42 = vand.u32 4294901760, %v915_v37  ;;  %v1209_v4 = vsub.f32 %v6401_v56, %v6406_v59  ;;  %v1501_v6 = vsel %vm232_vm3, %v1496_v3, 0 }
  0xc7   : > { %v1233_v57 = vsub.f32 %v1231_v51, %v1232_v54  ;;  %v1520_v9 = vand.u32 4294901760, %v1501_v6 }
  0xc8   : > { %v1210_v8 = vand.u32 4294901760, %v1209_v4 }
  0xc9   : > { %v1234_v62 = vand.u32 4294901760, %v1233_v57 }
  0xca   : > { %599 = vmatmul.f32.vlgmr.msrb.gmra.mxu1 %v6315_v2  ;;  %671 = vmatmul.f32.vlgmr.msra.gmra.mxu0 %v6315_v2 }
  0xcb   : > { %745 = vmatmul.f32.vlgmr.msra.gmra.mxu3 %v6315_v2  ;;  %789 = vmatpush.msrb.mxu1 %v6301_v50  ;;  %v6387_v50 = vand.u32 4294901760, %v1187_v46 }
  0xcc   : > { %887 = vmatpush.msra.mxu0 %v886_v25  ;;  %963 = vmatpush.msra.mxu3 %v886_v25 }
  0xcd   : > { %719 = vmatmul.f32.vlgmr.msra.gmra.mxu2 %v572_v24  ;;  %v1377_v16 = vsub.f32 %v1187_v46, %v6387_v50  ;;  %v1810_v24 = vpop.permute.xlu0 %1809 }
  0xce   : > { %940 = vmatpush.msra.mxu2 %v913_v26  ;;  %v1816_v26 = vsel %vm1815_vm6, %v1810_v24, %v1812_v23 }
  0xcf   : > { %v1378_v55 = vand.u32 4294901760, %v1377_v16  ;;  %v1821_v31 = vsel %vm232_vm3, %v1816_v26, 0 }
  0xd1   : > { %v1379_v58 = vsub.f32 %v1377_v16, %v1378_v55 }
  0xd2   : > { %693 = vmatmul.f32.vlgmr.msra.gmra.mxu1 %v6315_v2  ;;  %769 = vmatmul.f32.vlgmr.msrb.gmra.mxu0 %v6322_v7  ;;  %v1503_v7 = vsel %vm232_vm3, %v1497_v5, 0 }
  0xd3   : > { %839 = vmatmul.f32.vlgmr.msrb.gmra.mxu3 %v6315_v2  ;;  %917 = vmatpush.msra.mxu1 %v916_v42  ;;  %v6421_v10 = vand.u32 4294901760, %v1503_v7 }
  0xd4   : > { %989 = vmatpush.msrb.mxu0 %v914_v34  ;;  %1063 = vmatpush.msrb.mxu3 %v1062_v43  ;;  %v1840_v34 = vand.u32 4294901760, %v1821_v31 }
  0xd5   : > { %817 = vmatmul.f32.vlgmr.msrb.gmra.mxu2 %v6315_v2  ;;  %v1380_v2 = vand.u32 4294901760, %v1379_v58  ;;  %v1693_v14 = vsub.f32 %v1503_v7, %v6421_v10  ;;  %v6024_v58 = vld [vmem:[%s7165_s1 + $0x28] sm:$0xff] }
  0xd6   : > { %1033 = vmatpush.msrb.mxu2 %v6345_v27  ;;  %v1867_v37 = vsub.f32 %v1821_v31, %v1840_v34  ;;  %v2147_v60 = vsel %vm228_vm0, %v6024_v58, 0 }
  0xd7   : > { %v1694_v1 = vand.u32 4294901760, %v1693_v14 }
  0xd9   : > { %v1695_v21 = vsub.f32 %v1693_v14, %v1694_v1 }
  0xda   : > { %793 = vmatmul.f32.vlgmr.msrb.gmra.mxu1 %v6330_v12  ;;  %893 = vmatmul.f32.vlgmr.msra.gmra.mxu0 %v892_v47  ;;  %v1547_v12 = vsub.f32 %v1501_v6, %v1520_v9 }
  0xdb   : > { %967 = vmatmul.f32.vlgmr.msra.gmra.mxu3 %v6370_v41  ;;  %1011 = vmatpush.msrb.mxu1 %v886_v25  ;;  %v1696_v28 = vand.u32 4294901760, %v1695_v21 }
  0xdc   : > { %1086 = vmatpush.msra.mxu0 %v1059_v30  ;;  %1157 = vmatpush.msra.mxu3 %v6345_v27  ;;  %v1548_v18 = vand.u32 4294901760, %v1547_v12 }
  0xdd   : > { %943 = vmatmul.f32.vlgmr.msra.gmra.mxu2 %v6364_v36 }
  0xde   : > { %1135 = vmatpush.msra.mxu2 %v1060_v35  ;;  %v1549_v20 = vsub.f32 %v1547_v12, %v1548_v18 }
  0xe0   : > { %v1550_v25 = vand.u32 4294901760, %v1549_v20 }
  0xe2   : > { %919 = vmatmul.f32.vlgmr.msra.gmra.mxu1 %v6358_v33  ;;  %991 = vmatmul.f32.vlgmr.msrb.gmra.mxu0 %v6358_v33 }
  0xe3   : > { %1065 = vmatmul.f32.vlgmr.msrb.gmra.mxu3 %v6358_v33  ;;  %1109 = vmatpush.msra.mxu1 %v6345_v27  ;;  %v1814_v27 = vpop.permute.xlu2 %1813 }
  0xe4   : > { %1205 = vmatpush.msrb.mxu0 %v1204_v48  ;;  %1281 = vmatpush.msrb.mxu3 %v1204_v48  ;;  %v1817_v30 = vsel %vm1815_vm6, %v1812_v23, %v1814_v27 }
  0xe5   : > { %1039 = vmatmul.f32.vlgmr.msrb.gmra.mxu2 %v892_v47  ;;  %v1823_v32 = vsel %vm232_vm3, %v1817_v30, 0  ;;  %v2140_v47 = vpop.permute.xlu1 %2139 }
  0xe6   : > { %1258 = vmatpush.msrb.mxu2 %v1231_v51  ;;  %v6455_v35 = vand.u32 4294901760, %v1823_v32 }
  0xe8   : > { %v2013_v39 = vsub.f32 %v1823_v32, %v6455_v35 }
  0xea   : > { %1013 = vmatmul.f32.vlgmr.msrb.gmra.mxu1 %v6358_v33  ;;  %1089 = vmatmul.f32.vlgmr.msra.gmra.mxu0 %v6364_v36  ;;  %v6022_v36 = vld [vmem:[%s7165_s1 + $0x38] sm:$0xff]  ;;  %v2014_v42 = vand.u32 4294901760, %v2013_v39 }
  0xeb   : > { %1159 = vmatmul.f32.vlgmr.msra.gmra.mxu3 %v6358_v33  ;;  %1235 = vmatpush.msrb.mxu1 %v1234_v62  ;;  %v1819_v38 = vsel %vm228_vm0, %v6022_v36, 0  ;;  %v6505_v62 = vand.u32 4294901760, %v2147_v60 }
  0xec   : > { %1307 = vmatpush.msra.mxu0 %v1232_v54  ;;  %1381 = vmatpush.msra.mxu3 %v1380_v2  ;;  %v6466_v40 = vand.u32 4294901760, %v1819_v38  ;;  %v2015_v45 = vsub.f32 %v2013_v39, %v2014_v42 }
  0xed   : > { %1137 = vmatmul.f32.vlgmr.msra.gmra.mxu2 %v6358_v33  ;;  %v1526_v33 = vand.u32 4294901760, %v1525_v29  ;;  %v6511_v4 = vsub.f32 %v2147_v60, %v6505_v62 }
  0xee   : > { %1351 = vmatpush.msra.mxu2 %v6387_v50  ;;  %v6471_v43 = vsub.f32 %v1819_v38, %v6466_v40  ;;  %v2016_v15 = vand.u32 4294901760, %v2015_v45 }
  0xf0   : > { %v6476_v46 = vand.u32 4294901760, %v6471_v43 }
  0xf2   : > { %1113 = vmatmul.f32.vlgmr.msra.gmra.mxu1 %v6370_v41  ;;  %1211 = vmatmul.f32.vlgmr.msrb.gmra.mxu0 %v1210_v8  ;;  %v1868_v41 = vand.u32 4294901760, %v1867_v37 }
  0xf3   : > { %1285 = vmatmul.f32.vlgmr.msrb.gmra.mxu3 %v6406_v59  ;;  %1329 = vmatpush.msra.mxu1 %v1204_v48  ;;  %v2138_v48 = vpop.permute.xlu0 %2137 }
  0xf4   : > { %1404 = vmatpush.msrb.mxu0 %v1377_v16  ;;  %1475 = vmatpush.msrb.mxu3 %v6387_v50  ;;  %v1869_v44 = vsub.f32 %v1867_v37, %v1868_v41  ;;  %v2144_v51 = vsel %vm2143_vm7, %v2138_v48, %v2140_v47  ;;  %v1845_v16 = vsub.f32 %v6471_v43, %v6476_v46 }
  0xf5   : > { %1261 = vmatmul.f32.vlgmr.msrb.gmra.mxu2 %v6401_v56 }
  0xf6   : > { %1453 = vmatpush.msrb.mxu2 %v1378_v55  ;;  %v1870_v49 = vand.u32 4294901760, %v1869_v44  ;;  %v1846_v55 = vand.u32 4294901760, %v1845_v16 }
  0xfa   : > { %1237 = vmatmul.f32.vlgmr.msrb.gmra.mxu1 %v6395_v53  ;;  %1309 = vmatmul.f32.vlgmr.msra.gmra.mxu0 %v6395_v53 }
  0xfb   : > { %1383 = vmatmul.f32.vlgmr.msra.gmra.mxu3 %v6395_v53  ;;  %1427 = vmatpush.msrb.mxu1 %v6387_v50  ;;  %v2142_v50 = vpop.permute.xlu2 %2141  ;;  %v2454_v11 = vpop.permute.xlu0 %2453 }
  0xfc   : > { %1521 = vmatpush.msra.mxu0 %v1520_v9  ;;  %1597 = vmatpush.msra.mxu3 %v1520_v9  ;;  %v2145_v52 = vsel %vm2143_vm7, %v2140_v47, %v2142_v50 }
  0xfd   : > { %1357 = vmatmul.f32.vlgmr.msra.gmra.mxu2 %v1210_v8  ;;  %v2151_v54 = vsel %vm232_vm3, %v2145_v52, 0 }
  0xfe   : > { %1574 = vmatpush.msra.mxu2 %v1547_v12  ;;  %v6491_v57 = vand.u32 4294901760, %v2151_v54 }
 0x100   : > { %v6502_v61 = vsub.f32 %v2151_v54, %v6491_v57 }
 0x102   : > { %1331 = vmatmul.f32.vlgmr.msra.gmra.mxu1 %v6395_v53  ;;  %1407 = vmatmul.f32.vlgmr.msrb.gmra.mxu0 %v6401_v56  ;;  %v2342_v3 = vand.u32 4294901760, %v6502_v61 }
 0x103   : > { %1477 = vmatmul.f32.vlgmr.msrb.gmra.mxu3 %v6395_v53  ;;  %1551 = vmatpush.msra.mxu1 %v1550_v25  ;;  %v2458_v8 = vpop.permute.xlu2 %2457 }
 0x104   : > { %1623 = vmatpush.msrb.mxu0 %v1548_v18  ;;  %1697 = vmatpush.msrb.mxu3 %v1696_v28  ;;  %v2343_v6 = vsub.f32 %v6502_v61, %v2342_v3 }
 0x105   : > { %1455 = vmatmul.f32.vlgmr.msrb.gmra.mxu2 %v6395_v53  ;;  %v2149_v53 = vsel %vm232_vm3, %v2144_v51, 0 }
 0x106   : > { %1667 = vmatpush.msrb.mxu2 %v6421_v10  ;;  %v6489_v56 = vand.u32 4294901760, %v2149_v53 }
 0x10a   : > { %1431 = vmatmul.f32.vlgmr.msrb.gmra.mxu1 %v6406_v59  ;;  %1527 = vmatmul.f32.vlgmr.msra.gmra.mxu0 %v1526_v33  ;;  %v2195_v59 = vsub.f32 %v2149_v53, %v6489_v56 }
 0x10b   : > { %1601 = vmatmul.f32.vlgmr.msra.gmra.mxu3 %v6442_v22  ;;  %1645 = vmatpush.msrb.mxu1 %v1520_v9  ;;  %v6519_v9 = vand.u32 4294901760, %v6511_v4 }
 0x10c   : > { %1720 = vmatpush.msra.mxu0 %v1693_v14  ;;  %1791 = vmatpush.msra.mxu3 %v6421_v10  ;;  %v2196_v2 = vand.u32 4294901760, %v2195_v59 }
 0x10d   : > { %1577 = vmatmul.f32.vlgmr.msra.gmra.mxu2 %v6437_v19  ;;  %v2173_v21 = vsub.f32 %v6511_v4, %v6519_v9 }
 0x10e   : > { %1769 = vmatpush.msra.mxu2 %v1694_v1  ;;  %v2197_v5 = vsub.f32 %v2195_v59, %v2196_v2  ;;  %v2344_v1 = vand.u32 4294901760, %v2343_v6 }
 0x10f   : > { %v2174_v26 = vand.u32 4294901760, %v2173_v21 }
 0x110   : > { %v2198_v14 = vand.u32 4294901760, %v2197_v5 }
 0x112   : > { %1553 = vmatmul.f32.vlgmr.msra.gmra.mxu1 %v6432_v17  ;;  %1625 = vmatmul.f32.vlgmr.msrb.gmra.mxu0 %v6432_v17 }
 0x113   : > { %1699 = vmatmul.f32.vlgmr.msrb.gmra.mxu3 %v6432_v17  ;;  %1743 = vmatpush.msra.mxu1 %v6421_v10  ;;  %v2456_v10 = vpop.permute.xlu1 %2455 }
 0x114   : > { %1841 = vmatpush.msrb.mxu0 %v1840_v34  ;;  %1917 = vmatpush.msrb.mxu3 %v1840_v34 }
 0x115   : > { %1673 = vmatmul.f32.vlgmr.msrb.gmra.mxu2 %v1526_v33 }
 0x116   : > { %1894 = vmatpush.msrb.mxu2 %v1867_v37 }
 0x11a   : > { %1647 = vmatmul.f32.vlgmr.msrb.gmra.mxu1 %v6432_v17  ;;  %1723 = vmatmul.f32.vlgmr.msra.gmra.mxu0 %v6437_v19  ;;  %v2460_v19 = vsel %vm2459_vm8, %v2454_v11, %v2456_v10  ;;  %v2774_v54 = vpop.permute.xlu0 %2773 }
 0x11b   : > { %1793 = vmatmul.f32.vlgmr.msra.gmra.mxu3 %v6432_v17  ;;  %1871 = vmatpush.msrb.mxu1 %v1870_v49  ;;  %v2465_v24 = vsel %vm232_vm3, %v2460_v19, 0  ;;  %v2776_v16 = vpop.permute.xlu1 %2775 }
 0x11c   : > { %1943 = vmatpush.msra.mxu0 %v1868_v41  ;;  %2017 = vmatpush.msra.mxu3 %v2016_v15  ;;  %v6536_v30 = vand.u32 4294901760, %v2465_v24 }
 0x11d   : > { %1771 = vmatmul.f32.vlgmr.msra.gmra.mxu2 %v6432_v17 }
 0x11e   : > { %1987 = vmatpush.msra.mxu2 %v6455_v35  ;;  %v2511_v37 = vsub.f32 %v2465_v24, %v6536_v30 }
 0x122   : > { %1747 = vmatmul.f32.vlgmr.msra.gmra.mxu1 %v6442_v22  ;;  %1847 = vmatmul.f32.vlgmr.msrb.gmra.mxu0 %v1846_v55  ;;  %v2461_v22 = vsel %vm2459_vm8, %v2456_v10, %v2458_v8 }
 0x123   : > { %1921 = vmatmul.f32.vlgmr.msrb.gmra.mxu3 %v6476_v46  ;;  %1965 = vmatpush.msra.mxu1 %v1840_v34  ;;  %v2467_v25 = vsel %vm232_vm3, %v2461_v22, 0  ;;  %v6023_v34 = vld [vmem:[%s7165_s1 + $0x10] sm:$0xff] }
 0x124   : > { %2040 = vmatpush.msrb.mxu0 %v2013_v39  ;;  %2111 = vmatpush.msrb.mxu3 %v6455_v35  ;;  %v6538_v33 = vand.u32 4294901760, %v2467_v25  ;;  %v2463_v38 = vsel %vm228_vm0, %v6023_v34, 0 }
 0x125   : > { %1897 = vmatmul.f32.vlgmr.msrb.gmra.mxu2 %v6471_v43  ;;  %v6554_v41 = vand.u32 4294901760, %v2463_v38 }
 0x126   : > { %2089 = vmatpush.msrb.mxu2 %v2014_v42  ;;  %v6551_v39 = vsub.f32 %v2467_v25, %v6538_v33 }
 0x127   : > { %v260_v63 = vpop.f32.mrf.mxu0  ;;  %v6562_v49 = vsub.f32 %v2463_v38, %v6554_v41 }
 0x128   : > { %v2658_v47 = vand.u32 4294901760, %v6551_v39 }
 0x129   : > { %v6574_v53 = vand.u32 4294901760, %v6562_v49 }
 0x12a   : > { %1873 = vmatmul.f32.vlgmr.msrb.gmra.mxu1 %v6466_v40  ;;  %1945 = vmatmul.f32.vlgmr.msra.gmra.mxu0 %v6466_v40  ;;  %v2659_v51 = vsub.f32 %v6551_v39, %v2658_v47 }
 0x12b   : > { %2019 = vmatmul.f32.vlgmr.msra.gmra.mxu3 %v6466_v40  ;;  %2063 = vmatpush.msrb.mxu1 %v6455_v35 }
 0x12c   : > { %2169 = vmatpush.msra.mxu0 %v6489_v56  ;;  %2245 = vmatpush.msra.mxu3 %v6489_v56  ;;  %v2660_v60 = vand.u32 4294901760, %v2659_v51 }
 0x12d   : > { %1993 = vmatmul.f32.vlgmr.msra.gmra.mxu2 %v1846_v55  ;;  %v334_v7 = vpop.f32.mrf.mxu3 }
 0x12e   : > { %2222 = vmatpush.msra.mxu2 %v2195_v59 }
 0x12f   : > { %v286_v12 = vpop.f32.mrf.mxu1  ;;  %v310_v13 = vpop.f32.mrf.mxu2 }
 0x130   : > { %v287_v17 = vadd.f32 %v286_v12, %v260_v63  ;;  %v358_v18 = vpop.f32.mrf.mxu0  ;;  %v2489_v63 = vsub.f32 %v6562_v49, %v6574_v53 }
 0x132   : > { %v311_v20 = vadd.f32 %v310_v13, %v287_v17  ;;  %1967 = vmatmul.f32.vlgmr.msra.gmra.mxu1 %v6466_v40  ;;  %2043 = vmatmul.f32.vlgmr.msrb.gmra.mxu0 %v6471_v43  ;;  %v2512_v43 = vand.u32 4294901760, %v2511_v37 }
 0x133   : > { %2113 = vmatmul.f32.vlgmr.msrb.gmra.mxu3 %v6466_v40  ;;  %2199 = vmatpush.msra.mxu1 %v2198_v14 }
 0x134   : > { %v335_v23 = vadd.f32 %v334_v7, %v311_v20  ;;  %2271 = vmatpush.msrb.mxu0 %v2196_v2  ;;  %2345 = vmatpush.msrb.mxu3 %v2344_v1  ;;  %v2513_v50 = vsub.f32 %v2511_v37, %v2512_v43 }
 0x135   : > { %2091 = vmatmul.f32.vlgmr.msrb.gmra.mxu2 %v6466_v40 }
 0x136   : > { %v6531_v27 = vadd.f32 %v358_v18, %v335_v23  ;;  %v432_v28 = vpop.f32.mrf.mxu3  ;;  %2315 = vmatpush.msrb.mxu2 %v6491_v57 }
 0x137   : > { %v6534_v29 = vpop.f32.mrf.mxu1  ;;  %v406_v31 = vpop.f32.mrf.mxu2 }
 0x138   : > { %v456_v32 = vpop.f32.mrf.mxu0  ;;  %v433_v35 = vadd.f32 %v432_v28, %v406_v31 }
 0x13a   : > { %2067 = vmatmul.f32.vlgmr.msrb.gmra.mxu1 %v6476_v46  ;;  %2175 = vmatmul.f32.vlgmr.msra.gmra.mxu0 %v2174_v26  ;;  %v457_v36 = vadd.f32 %v456_v32, %v433_v35 }
 0x13b   : > { %2249 = vmatmul.f32.vlgmr.msra.gmra.mxu3 %v6519_v9  ;;  %2293 = vmatpush.msrb.mxu1 %v6489_v56  ;;  %v2514_v56 = vand.u32 4294901760, %v2513_v50 }
 0x13c   : > { %2368 = vmatpush.msra.mxu0 %v6502_v61  ;;  %2439 = vmatpush.msra.mxu3 %v6491_v57  ;;  %v2780_v61 = vsel %vm2779_vm9, %v2774_v54, %v2776_v16 }
 0x13d   : > { %2225 = vmatmul.f32.vlgmr.msra.gmra.mxu2 %v6511_v4 }
 0x13e   : > { %2417 = vmatpush.msra.mxu2 %v2342_v3  ;;  %v526_v40 = vpop.f32.mrf.mxu3  ;;  %v2785_v3 = vsel %vm232_vm3, %v2780_v61, 0 }
 0x13f   : > { %v480_v42 = vpop.f32.mrf.mxu1  ;;  %v2804_v8 = vand.u32 4294901760, %v2785_v3 }
 0x140   : > { %v481_v44 = vadd.f32 %v480_v42, %v457_v36  ;;  %v504_v45 = vpop.f32.mrf.mxu2  ;;  %v6556_v46 = vpop.f32.mrf.mxu0 }
 0x141   : > { %v2831_v13 = vsub.f32 %v2785_v3, %v2804_v8 }
 0x142   : > { %v505_v48 = vadd.f32 %v504_v45, %v481_v44  ;;  %2201 = vmatmul.f32.vlgmr.msra.gmra.mxu1 %v6505_v62  ;;  %2273 = vmatmul.f32.vlgmr.msrb.gmra.mxu0 %v6505_v62 }
 0x143   : > { %2347 = vmatmul.f32.vlgmr.msrb.gmra.mxu3 %v6505_v62  ;;  %2391 = vmatpush.msra.mxu1 %v6491_v57  ;;  %v2778_v57 = vpop.permute.xlu2 %2777  ;;  %v2832_v19 = vand.u32 4294901760, %v2831_v13 }
 0x144   : > { %v6566_v15 = vadd.f32 %v526_v40, %v505_v48  ;;  %2485 = vmatpush.msrb.mxu0 %v6536_v30  ;;  %2561 = vmatpush.msrb.mxu3 %v6536_v30  ;;  %v2781_v2 = vsel %vm2779_vm9, %v2776_v16, %v2778_v57 }
 0x145   : > { %2321 = vmatmul.f32.vlgmr.msrb.gmra.mxu2 %v2174_v26  ;;  %v2787_v5 = vsel %vm232_vm3, %v2781_v2, 0  ;;  %v2833_v24 = vsub.f32 %v2831_v13, %v2832_v19 }
 0x146   : > { %v6571_v52 = vpop.f32.mrf.mxu3  ;;  %2538 = vmatpush.msrb.mxu2 %v2511_v37  ;;  %v6601_v12 = vand.u32 4294901760, %v2787_v5 }
 0x147   : > { %7172 = vst [vmem:[#allocation7_spill] sm:$0xff] %v6571_v52  ;;  %v6576_v55 = vpop.f32.mrf.mxu1  ;;  %v2834_v31 = vand.u32 4294901760, %v2833_v24 }
 0x148   : > { %v6578_v58 = vpop.f32.mrf.mxu2  ;;  %v6580_v59 = vpop.f32.mrf.mxu0  ;;  %v2977_v17 = vsub.f32 %v2787_v5, %v6601_v12 }
 0x149   : > { %7173 = vst [vmem:[#allocation8_spill] sm:$0xff] %v6580_v59 }
 0x14a   : > { %2295 = vmatmul.f32.vlgmr.msrb.gmra.mxu1 %v6505_v62  ;;  %2371 = vmatmul.f32.vlgmr.msra.gmra.mxu0 %v6511_v4  ;;  %v2490_v4 = vand.u32 4294901760, %v2489_v63  ;;  %v2978_v22 = vand.u32 4294901760, %v2977_v17 }
 0x14b   : > { %2441 = vmatmul.f32.vlgmr.msra.gmra.mxu3 %v6505_v62  ;;  %2515 = vmatpush.msrb.mxu1 %v2514_v56 }
 0x14c   : > { %2587 = vmatpush.msra.mxu0 %v2512_v43  ;;  %2661 = vmatpush.msra.mxu3 %v2660_v60  ;;  %v2979_v25 = vsub.f32 %v2977_v17, %v2978_v22 }
 0x14d   : > { %2419 = vmatmul.f32.vlgmr.msra.gmra.mxu2 %v6505_v62  ;;  %v6025_v62 = vld [vmem:[%s7165_s1 + $0x40] sm:$0xff] }
 0x14e   : > { %v6592_v6 = vpop.f32.mrf.mxu3  ;;  %2631 = vmatpush.msra.mxu2 %v6538_v33  ;;  %v2783_v14 = vsel %vm228_vm0, %v6025_v62, 0  ;;  %v2980_v35 = vand.u32 4294901760, %v2979_v25 }
 0x14f   : > { %v6595_v7 = vpop.f32.mrf.mxu1 }
 0x150   : > { %7174 = vst [vmem:[#allocation9_spill] sm:$0xff] %v6595_v7  ;;  %v6597_v10 = vpop.f32.mrf.mxu2  ;;  %v6599_v11 = vpop.f32.mrf.mxu0 }
 0x151   : > { %7175 = vst [vmem:[#allocation10_spill] sm:$0xff] %v6599_v11 }
 0x152   : > { %2395 = vmatmul.f32.vlgmr.msra.gmra.mxu1 %v6519_v9  ;;  %2491 = vmatmul.f32.vlgmr.msrb.gmra.mxu0 %v2490_v4  ;;  %v2806_v9 = vand.u32 4294901760, %v2783_v14 }
 0x153   : > { %2565 = vmatmul.f32.vlgmr.msrb.gmra.mxu3 %v6574_v53  ;;  %2609 = vmatpush.msra.mxu1 %v6536_v30 }
 0x154   : > { %2684 = vmatpush.msrb.mxu0 %v6551_v39  ;;  %2755 = vmatpush.msrb.mxu3 %v6538_v33  ;;  %v2807_v23 = vsub.f32 %v2783_v14, %v2806_v9 }
 0x155   : > { %2541 = vmatmul.f32.vlgmr.msrb.gmra.mxu2 %v6562_v49 }
 0x156   : > { %2733 = vmatpush.msrb.mxu2 %v2658_v47  ;;  %v6614_v18 = vpop.f32.mrf.mxu3  ;;  %v2808_v26 = vand.u32 4294901760, %v2807_v23 }
 0x157   : > { %7176 = vst [vmem:[#allocation11_spill] sm:$0xff] %v6614_v18  ;;  %v6616_v1 = vpop.f32.mrf.mxu1 }
 0x158   : > { %7177 = vst [vmem:[#allocation12_spill] sm:$0xff] %v6616_v1  ;;  %v6618_v20 = vpop.f32.mrf.mxu2  ;;  %v6620_v21 = vpop.f32.mrf.mxu0 }
 0x159   : > { %7178 = vst [vmem:[#allocation13_spill] sm:$0xff] %v6618_v20 }
 0x15a   : > { %2517 = vmatmul.f32.vlgmr.msrb.gmra.mxu1 %v6554_v41  ;;  %2589 = vmatmul.f32.vlgmr.msra.gmra.mxu0 %v6554_v41 }
 0x15b   : > { %2663 = vmatmul.f32.vlgmr.msra.gmra.mxu3 %v6554_v41  ;;  %2707 = vmatpush.msrb.mxu1 %v6538_v33  ;;  %v2809_v33 = vsub.f32 %v2807_v23, %v2808_v26 }
 0x15c   : > { %2805 = vmatpush.msra.mxu0 %v2804_v8  ;;  %2881 = vmatpush.msra.mxu3 %v2804_v8 }
 0x15d   : > { %2637 = vmatmul.f32.vlgmr.msra.gmra.mxu2 %v2490_v4  ;;  %v2810_v37 = vand.u32 4294901760, %v2809_v33 }
 0x15e   : > { %v6626_v28 = vpop.f32.mrf.mxu3  ;;  %2858 = vmatpush.msra.mxu2 %v2831_v13 }
 0x15f   : > { %7179 = vst [vmem:[#allocation14_spill] sm:$0xff] %v6626_v28  ;;  %v6628_v30 = vpop.f32.mrf.mxu1 }
 0x160   : > { %v6630_v32 = vpop.f32.mrf.mxu2  ;;  %v6632_v34 = vpop.f32.mrf.mxu0 }
 0x161   : > { %7180 = vst [vmem:[#allocation15_spill] sm:$0xff] %v6632_v34 }
 0x162   : > { %2611 = vmatmul.f32.vlgmr.msra.gmra.mxu1 %v6554_v41  ;;  %2687 = vmatmul.f32.vlgmr.msrb.gmra.mxu0 %v6562_v49 }
 0x163   : > { %2757 = vmatmul.f32.vlgmr.msrb.gmra.mxu3 %v6554_v41  ;;  %2835 = vmatpush.msra.mxu1 %v2834_v31 }
 0x164   : > { %2907 = vmatpush.msrb.mxu0 %v2832_v19  ;;  %2981 = vmatpush.msrb.mxu3 %v2980_v35 }
 0x165   : > { %2735 = vmatmul.f32.vlgmr.msrb.gmra.mxu2 %v6554_v41 }
 0x166   : > { %v6638_v36 = vpop.f32.mrf.mxu3  ;;  %2951 = vmatpush.msrb.mxu2 %v6601_v12 }
 0x167   : > { %v6641_v38 = vpop.f32.mrf.mxu1 }
 0x168   : > { %7181 = vst [vmem:[#allocation16_spill] sm:$0xff] %v6641_v38  ;;  %v6643_v39 = vpop.f32.mrf.mxu2  ;;  %v6645_v40 = vpop.f32.mrf.mxu0 }
 0x169   : > { %7182 = vst [vmem:[#allocation17_spill] sm:$0xff] %v6645_v40 }
 0x16a   : > { %2711 = vmatmul.f32.vlgmr.msrb.gmra.mxu1 %v6574_v53  ;;  %2811 = vmatmul.f32.vlgmr.msra.gmra.mxu0 %v2810_v37 }
 0x16b   : > { %2885 = vmatmul.f32.vlgmr.msra.gmra.mxu3 %v2808_v26  ;;  %2929 = vmatpush.msrb.mxu1 %v2804_v8 }
 0x16c   : > { %3004 = vmatpush.msra.mxu0 %v2977_v17  ;;  %3075 = vmatpush.msra.mxu3 %v6601_v12 }
 0x16d   : > { %2861 = vmatmul.f32.vlgmr.msra.gmra.mxu2 %v2807_v23 }
 0x16e   : > { %3053 = vmatpush.msra.mxu2 %v2978_v22  ;;  %v6649_v41 = vpop.f32.mrf.mxu3 }
 0x16f   : > { %7183 = vst [vmem:[#allocation18_spill] sm:$0xff] %v6649_v41  ;;  %v6651_v42 = vpop.f32.mrf.mxu1 }
 0x170   : > { %7184 = vst [vmem:[#allocation19_spill] sm:$0xff] %v6651_v42  ;;  %v6653_v43 = vpop.f32.mrf.mxu2  ;;  %v6655_v44 = vpop.f32.mrf.mxu0 }
 0x171   : > { %7185 = vst [vmem:[#allocation20_spill] sm:$0xff] %v6653_v43 }
 0x172   : > { %2837 = vmatmul.f32.vlgmr.msra.gmra.mxu1 %v2806_v9  ;;  %2909 = vmatmul.f32.vlgmr.msrb.gmra.mxu0 %v2806_v9 }
 0x173   : > { %3027 = vmatpush.msra.mxu1 %v6601_v12  ;;  %2983 = vmatmul.f32.vlgmr.msrb.gmra.mxu3 %v2806_v9 }
 0x175   : > { %2957 = vmatmul.f32.vlgmr.msrb.gmra.mxu2 %v2810_v37 }
 0x176   : > { %v6658_v45 = vpop.f32.mrf.mxu3 }
 0x177   : > { %v1238_v47 = vpop.f32.mrf.mxu1 }
 0x178   : > { %v6660_v48 = vpop.f32.mrf.mxu2  ;;  %v6662_v49 = vpop.f32.mrf.mxu0  ;;  %v1239_v34 = vadd.f32 %v1238_v47, %v6655_v44 }
 0x17a   : > { %2931 = vmatmul.f32.vlgmr.msrb.gmra.mxu1 %v2806_v9  ;;  %3007 = vmatmul.f32.vlgmr.msra.gmra.mxu0 %v2807_v23  ;;  %v1263_v11 = vadd.f32 %v6660_v48, %v1239_v34 }
 0x17b   : > { %3077 = vmatmul.f32.vlgmr.msra.gmra.mxu3 %v2806_v9 }
 0x17c   : > { %v1287_v28 = vadd.f32 %v6658_v45, %v1263_v11 }
 0x17d   : > { %3055 = vmatmul.f32.vlgmr.msra.gmra.mxu2 %v2806_v9 }
 0x17e   : > { %v1384_v50 = vpop.f32.mrf.mxu3 }
 0x17f   : > { %v6664_v51 = vpop.f32.mrf.mxu1 }
 0x180   : > { %v1358_v16 = vpop.f32.mrf.mxu2  ;;  %v1408_v53 = vpop.f32.mrf.mxu0 }
 0x182   : > { %3031 = vmatmul.f32.vlgmr.msra.gmra.mxu1 %v2808_v26 }
 0x186   : > { %v6666_v54 = vpop.f32.mrf.mxu3 }
 0x187   : > { %v1432_v56 = vpop.f32.mrf.mxu1 }
 0x188   : > { %v6668_v57 = vpop.f32.mrf.mxu2  ;;  %v6670_v60 = vpop.f32.mrf.mxu0 }
 0x18e   : > { %v6672_v61 = vpop.f32.mrf.mxu3 }
 0x18f   : > { %7186 = vst [vmem:[#allocation21_spill] sm:$0xff] %v6672_v61  ;;  %v6674_v63 = vpop.f32.mrf.mxu1 }
 0x190   : > { %v6676_v2 = vpop.f32.mrf.mxu2  ;;  %v6678_v3 = vpop.f32.mrf.mxu0 }
 0x191   : > { %7187 = vst [vmem:[#allocation22_spill] sm:$0xff] %v6676_v2 }
 0x192   : > { %7188 = vst [vmem:[#allocation23_spill] sm:$0xff] %v6678_v3 }
 0x196   : > { %v6680_v5 = vpop.f32.mrf.mxu3 }
 0x197   : > { %v6682_v4 = vpop.f32.mrf.mxu1 }
 0x198   : > { %7189 = vst [vmem:[#allocation24_spill] sm:$0xff] %v6682_v4  ;;  %v6684_v8 = vpop.f32.mrf.mxu2  ;;  %v6686_v12 = vpop.f32.mrf.mxu0 }
 0x199   : > { %7190 = vst [vmem:[#allocation25_spill] sm:$0xff] %v6686_v12 }
 0x19e   : > { %v6688_v62 = vpop.f32.mrf.mxu3 }
 0x19f   : > { %7191 = vst [vmem:[#allocation26_spill] sm:$0xff] %v6688_v62  ;;  %v6690_v13 = vpop.f32.mrf.mxu1 }
 0x1a0   : > { %7192 = vst [vmem:[#allocation27_spill] sm:$0xff] %v6690_v13  ;;  %v6692_v14 = vpop.f32.mrf.mxu2  ;;  %v6694_v17 = vpop.f32.mrf.mxu0 }
 0x1a1   : > { %7193 = vst [vmem:[#allocation28_spill] sm:$0xff] %v6692_v14 }
 0x1a6   : > { %v6696_v9 = vpop.f32.mrf.mxu3 }
 0x1a7   : > { %7194 = vst [vmem:[#allocation29_spill] sm:$0xff] %v6696_v9  ;;  %v6698_v19 = vpop.f32.mrf.mxu1 }
 0x1a8   : > { %v6700_v22 = vpop.f32.mrf.mxu2  ;;  %v6702_v23 = vpop.f32.mrf.mxu0 }
 0x1a9   : > { %7195 = vst [vmem:[#allocation30_spill] sm:$0xff] %v6702_v23 }
 0x1ae   : > { %v6704_v24 = vpop.f32.mrf.mxu3 }
 0x1af   : > { %v6706_v25 = vpop.f32.mrf.mxu1 }
 0x1b0   : > { %7196 = vst [vmem:[#allocation31_spill] sm:$0xff] %v6706_v25  ;;  %v6708_v26 = vpop.f32.mrf.mxu2  ;;  %v6710_v31 = vpop.f32.mrf.mxu0 }
 0x1b1   : > { %7197 = vst [vmem:[#allocation32_spill] sm:$0xff] %v6710_v31 }
 0x1b6   : > { %v6712_v35 = vpop.f32.mrf.mxu3 }
 0x1b7   : > { %7198 = vst [vmem:[#allocation33_spill] sm:$0xff] %v6712_v35  ;;  %v6714_v33 = vpop.f32.mrf.mxu1 }
 0x1b8   : > { %7199 = vst [vmem:[#allocation34_spill] sm:$0xff] %v6714_v33  ;;  %v6716_v37 = vpop.f32.mrf.mxu2  ;;  %v2176_v0 = vpop.f32.mrf.mxu0  ;;  %v1385_v33 = vadd.f32 %v1384_v50, %v1358_v16 }
 0x1b9   : > { %7200 = vst [vmem:[#allocation35_spill] sm:$0xff] %v6716_v37 }
 0x1ba   : > { %v1409_v2 = vadd.f32 %v1408_v53, %v1385_v33  ;;  %v921_v53 = vadd.f32 %v6628_v30, %v6620_v21  ;;  %v1067_v21 = vadd.f32 %v6638_v36, %v6643_v39  ;;  %v7211_v33 = vld [vmem:[#allocation29_spill] sm:$0xff] }
 0x1bc   : > { %v1433_v40 = vadd.f32 %v1432_v56, %v1409_v2 }
 0x1be   : > { %v2250_v62 = vpop.f32.mrf.mxu3  ;;  %v1457_v34 = vadd.f32 %v6668_v57, %v1433_v40 }
 0x1bf   : > { %v2202_v4 = vpop.f32.mrf.mxu1 }
 0x1c0   : > { %v2226_v18 = vpop.f32.mrf.mxu2  ;;  %v2274_v7 = vpop.f32.mrf.mxu0  ;;  %v2203_v37 = vadd.f32 %v2202_v4, %v2176_v0  ;;  %v1311_v4 = vadd.f32 %v6662_v49, %v1287_v28 }
 0x1c2   : > { %v2227_v12 = vadd.f32 %v2226_v18, %v2203_v37 }
 0x1c6   : > { %v2348_v41 = vpop.f32.mrf.mxu3 }
 0x1c7   : > { %v2296_v38 = vpop.f32.mrf.mxu1 }
 0x1c8   : > { %v2322_v14 = vpop.f32.mrf.mxu2  ;;  %v2372_v3 = vpop.f32.mrf.mxu0 }
 0x1c9   : > { %v2349_v31 = vadd.f32 %v2348_v41, %v2322_v14  ;;  %v381_v41 = vadd.f32 %v6534_v29, %v6531_v27  ;;  %v7205_v14 = vld [vmem:[#allocation22_spill] sm:$0xff] }
 0x1cb   : > { %v575_v45 = vadd.f32 %v6556_v46, %v381_v41  ;;  %v1875_v46 = vadd.f32 %v6698_v19, %v6694_v17  ;;  %v7206_v19 = vld [vmem:[#allocation32_spill] sm:$0xff] }
 0x1cd   : > { %v601_v40 = vadd.f32 %v6576_v55, %v575_v45  ;;  %v2021_v55 = vadd.f32 %v6704_v24, %v6708_v26  ;;  %v1899_v39 = vadd.f32 %v6700_v22, %v1875_v46  ;;  %v7207_v24 = vld [vmem:[#allocation10_spill] sm:$0xff] }
 0x1ce   : > { %v2442_v25 = vpop.f32.mrf.mxu3 }
 0x1cf   : > { %v2396_v20 = vpop.f32.mrf.mxu1  ;;  %v625_v2 = vadd.f32 %v6578_v58, %v601_v40  ;;  %v1923_v37 = vadd.f32 %v7211_v33, %v1899_v39  ;;  %v7224_v39 = vld [vmem:[#allocation23_spill] sm:$0xff] }
 0x1d0   : > { %v2420_v23 = vpop.f32.mrf.mxu2  ;;  %v2492_v59 = vpop.f32.mrf.mxu0 }
 0x1d6   : > { %v6718_v43 = vpop.f32.mrf.mxu3 }
 0x1d7   : > { %7201 = vst [vmem:[#allocation36_spill] sm:$0xff] %v6718_v43  ;;  %v2518_v35 = vpop.f32.mrf.mxu1  ;;  %v2251_v43 = vadd.f32 %v2250_v62, %v2227_v12 }
 0x1d8   : > { %v2542_v13 = vpop.f32.mrf.mxu2  ;;  %v6720_v61 = vpop.f32.mrf.mxu0 }
 0x1d9   : > { %7202 = vst [vmem:[#allocation37_spill] sm:$0xff] %v6720_v61  ;;  %v2373_v61 = vadd.f32 %v2372_v3, %v2349_v31  ;;  %v2275_v47 = vadd.f32 %v2274_v7, %v2251_v43  ;;  %v1333_v7 = vadd.f32 %v6664_v51, %v1311_v4  ;;  %v721_v43 = vadd.f32 %v6597_v10, %v6566_v15  ;;  %v7203_v3 = vld [vmem:[#allocation17_spill] sm:$0xff]  ;;  %v7209_v31 = vld [vmem:[#allocation7_spill] sm:$0xff]  ;;  %v7213_v4 = vld [vmem:[#allocation12_spill] sm:$0xff] }
 0x1da   : > { %v945_v15 = vadd.f32 %v6630_v32, %v921_v53  ;;  %v7204_v32 = vld [vmem:[#allocation14_spill] sm:$0xff]  ;;  %v7215_v53 = vld [vmem:[#allocation15_spill] sm:$0xff] }
 0x1db   : > { %v2397_v50 = vadd.f32 %v2396_v20, %v2373_v61  ;;  %v2297_v48 = vadd.f32 %v2296_v38, %v2275_v47  ;;  %v1479_v20 = vadd.f32 %v6666_v54, %v1457_v34  ;;  %v1529_v27 = vadd.f32 %v6670_v60, %v1333_v7 }
 0x1dc   : > { %v747_v57 = vadd.f32 %v6592_v6, %v721_v43  ;;  %v969_v62 = vadd.f32 %v7204_v32, %v945_v15  ;;  %v7217_v43 = vld [vmem:[#allocation27_spill] sm:$0xff]  ;;  %v7227_v32 = vld [vmem:[#allocation18_spill] sm:$0xff] }
 0x1dd   : > { %v2421_v11 = vadd.f32 %v2420_v23, %v2397_v50  ;;  %v2493_v28 = vadd.f32 %v2492_v59, %v2297_v48  ;;  %v1675_v29 = vadd.f32 %v6684_v8, %v1479_v20  ;;  %v1555_v59 = vadd.f32 %v6674_v63, %v1529_v27 }
 0x1de   : > { %v2664_v1 = vpop.f32.mrf.mxu3  ;;  %v1091_v8 = vadd.f32 %v7203_v3, %v1067_v21  ;;  %v169_v63 = vlaneseq  ;;  %v2045_v23 = vadd.f32 %v7206_v19, %v2021_v55  ;;  %v771_v6 = vadd.f32 %v7207_v24, %v747_v57  ;;  %v7214_v41 = vld [vmem:[#allocation36_spill] sm:$0xff]  ;;  %v7222_v55 = vld [vmem:[#allocation13_spill] sm:$0xff]  ;;  %v7229_v24 = vld [vmem:[#allocation31_spill] sm:$0xff] }
 0x1df   : > { %v6723_v9 = vpop.f32.mrf.mxu1  ;;  %v2443_v30 = vadd.f32 %v2442_v25, %v2421_v11  ;;  %v2519_v51 = vadd.f32 %v2518_v35, %v2493_v28  ;;  %v1701_v36 = vadd.f32 %v6680_v5, %v1675_v29  ;;  %v1579_v17 = vadd.f32 %v7205_v14, %v1555_v59  ;;  %v7210_v35 = vld [vmem:[#allocation25_spill] sm:$0xff] }
 0x1e0   : > { %v2638_v52 = vpop.f32.mrf.mxu2  ;;  %v6725_v42 = vpop.f32.mrf.mxu0  ;;  %v649_v5 = vadd.f32 %v7209_v31, %v625_v2  ;;  %v795_v34 = vadd.f32 %v7213_v4, %v771_v6  ;;  %v170_v45 = vand.u32 127, %v169_v63  ;;  %v993_v7 = vadd.f32 %v7215_v53, %v969_v62 }
 0x1e1   : > { %v2639_v60 = vadd.f32 %v2638_v52, %v2443_v30  ;;  %v2543_v12 = vadd.f32 %v2542_v13, %v2519_v51  ;;  %v7208_v52 = vld [vmem:[#allocation19_spill] sm:$0xff]  ;;  %v1725_v22 = vadd.f32 %v7210_v35, %v1701_v36  ;;  %v7212_v13 = vld [vmem:[#allocation34_spill] sm:$0xff] }
 0x1e2   : > { %v1115_v25 = vadd.f32 %v7208_v52, %v1091_v8  ;;  %v2069_v47 = vadd.f32 %v7212_v13, %v2045_v23  ;;  %v171_v30 = vadd.s32 128, %v170_v45  ;;  %v7220_v51 = vld [vmem:[#allocation30_spill] sm:$0xff]  ;;  %v819_v57 = vadd.f32 %v7222_v55, %v795_v34  ;;  %v7226_v8 = vld [vmem:[#allocation16_spill] sm:$0xff]  ;;  %v7230_v52 = vld [vmem:[#allocation33_spill] sm:$0xff] }
 0x1e3   : > { %v2665_v26 = vadd.f32 %v2664_v1, %v2639_v60  ;;  %v2567_v48 = vadd.f32 %v7214_v41, %v2543_v12  ;;  %v7216_v1 = vld [vmem:[#allocation21_spill] sm:$0xff]  ;;  %v1749_v28 = vadd.f32 %v7217_v43, %v1725_v22  ;;  %v176_v36 = vand.u32 15, %v170_v45 }
 0x1e4   : > { %v1603_v20 = vadd.f32 %v7216_v1, %v1579_v17  ;;  %v7223_v60 = vld [vmem:[#allocation37_spill] sm:$0xff]  ;;  %v1015_v12 = vadd.f32 %v7226_v8, %v993_v7  ;;  %v183_v23 = vand.u32 15, %v171_v30 }
 0x1e5   : > { %v2689_v27 = vadd.f32 %v6725_v42, %v2665_v26  ;;  %v7225_v42 = vld [vmem:[#allocation28_spill] sm:$0xff]  ;;  %v7228_v17 = vld [vmem:[#allocation9_spill] sm:$0xff]  ;;  %vm6794_vm10 = vcmp.ge.s32.totalorder %v176_v36, 1  ;;  %vm6804_vm12 = vcmp.lt.s32.totalorder %v176_v36, 15 }
 0x1e6   : > { %v6729_v0 = vpop.f32.mrf.mxu3  ;;  %v1627_v3 = vadd.f32 %v7224_v39, %v1603_v20  ;;  %vm6800_vm11 = vcmp.ge.s32.totalorder %v183_v23, 1  ;;  %vm6809_vm13 = vcmp.lt.s32.totalorder %v183_v23, 15 }
 0x1e7   : > { %v6731_v44 = vpop.f32.mrf.mxu1 }
 0x1e8   : > { %v6733_v16 = vpop.f32.mrf.mxu2  ;;  %v2812_v18 = vpop.f32.mrf.mxu0  ;;  %v2713_v2 = vadd.f32 %v6731_v44, %v2689_v27  ;;  %v7231_v44 = vld [vmem:[#allocation11_spill] sm:$0xff] }
 0x1ee   : > { %v2886_v49 = vpop.f32.mrf.mxu3 }
 0x1ef   : > { %v2838_v38 = vpop.f32.mrf.mxu1 }
 0x1f0   : > { %v2839_v54 = vadd.f32 %v2838_v38, %v2812_v18  ;;  %v2862_v56 = vpop.f32.mrf.mxu2  ;;  %v2910_v10 = vpop.f32.mrf.mxu0  ;;  %v7219_v38 = vld [vmem:[#allocation8_spill] sm:$0xff] }
 0x1f1   : > { %v673_v21 = vadd.f32 %v7219_v38, %v649_v5  ;;  %v2737_v5 = vadd.f32 %v6733_v16, %v2713_v2 }
 0x1f2   : > { %v2863_v61 = vadd.f32 %v2862_v56, %v2839_v54  ;;  %v1947_v54 = vadd.f32 %v7220_v51, %v1923_v37  ;;  %v7221_v56 = vld [vmem:[#allocation35_spill] sm:$0xff]  ;;  %v7234_v37 = vld [vmem:[#allocation24_spill] sm:$0xff] }
 0x1f3   : > { %v2093_v15 = vadd.f32 %v7221_v56, %v2069_v47  ;;  %v695_v19 = vadd.f32 %v7228_v17, %v673_v21  ;;  %v1649_v13 = vadd.f32 %v7234_v37, %v1627_v3  ;;  %v7235_v47 = vld [vmem:[#allocation26_spill] sm:$0xff]  ;;  %v2759_v53 = vadd.f32 %v6729_v0, %v2737_v5 }
 0x1f4   : > { %v2887_v58 = vadd.f32 %v2886_v49, %v2863_v61  ;;  %v7218_v49 = vld [vmem:[#allocation20_spill] sm:$0xff]  ;;  %v2591_v61 = vadd.f32 %v7223_v60, %v2567_v48  ;;  %v1969_v6 = vadd.f32 %v7229_v24, %v1947_v54  ;;  %v6169_v21 = vmov 256.0  }
 0x1f5   : > { %v1139_v40 = vadd.f32 %v7218_v49, %v1115_v25  ;;  %v2115_v25 = vadd.f32 %v7230_v52, %v2093_v15  ;;  %v1163_v4 = vadd.f32 %v1015_v12, %v695_v19  ;;  %6090 = vrcp.f32 %v6169_v21 }
 0x1f6   : > { %v2984_v18 = vpop.f32.mrf.mxu3  ;;  %v2911_v29 = vadd.f32 %v2910_v10, %v2887_v58  ;;  %v1773_v10 = vadd.f32 %v7225_v42, %v1749_v28  ;;  %v841_v58 = vadd.f32 %v7231_v44, %v819_v57  ;;  %v2613_v31 = vadd.f32 %v6723_v9, %v2591_v61 }
 0x1f7   : > { %v2932_v50 = vpop.f32.mrf.mxu1  ;;  %v1161_v62 = vadd.f32 %v7227_v32, %v1139_v40  ;;  %v2117_v9 = vadd.f32 %v1969_v6, %v1649_v13  ;;  %v1169_v20 = vsel %vm6794_vm10, %v1163_v4, 0.0  ;;  %v7242_v52 = vmov 0.0  }
 0x1f8   : > { %v2958_v11 = vpop.f32.mrf.mxu2  ;;  %v3008_v59 = vpop.f32.mrf.mxu0  ;;  %v2933_v63 = vadd.f32 %v2932_v50, %v2911_v29  ;;  %v1795_v50 = vadd.f32 %v7235_v47, %v1773_v10 }
 0x1f9   : > { %v2985_v46 = vadd.f32 %v2984_v18, %v2958_v11  ;;  %v1164_v34 = vadd.f32 %v1161_v62, %v841_v58  ;;  %v2119_v40 = vadd.f32 %v2117_v9, %v1169_v20 }
 0x1fa   : > { %v3081_v41 = vadd.f32 %v2933_v63, %v2613_v31  ;;  %v2118_v16 = vadd.f32 %v2115_v25, %v1795_v50  ;;  %v6026_v25 = vld [vmem:[%s7166_s2 + $0x18] sm:$0xff]  ;;  %v3137_v31 = vpop.permute.xlu2 %3136 }
 0x1fb   : > { %v3009_v14 = vadd.f32 %v3008_v59, %v2985_v46  ;;  %v1170_v43 = vsel %vm6800_vm11, %v1164_v34, 0.0  ;;  %v6091_v30 = vpop.eup %6090 }
 0x1fc   : > { %v3087_v49 = vsel %vm6804_vm12, %v3081_v41, 0.0  ;;  %v2120_v27 = vadd.f32 %v2118_v16, %v1170_v43  ;;  %v3095_v51 = vmul.f32 256.0, %v6091_v30  ;;  %vm3099_vm14 = vweird.f32 %v6091_v30 }
 0x1fd   : > { %v3089_v29 = vadd.f32 %v3087_v49, %v2119_v40 }
 0x1fe   : > { %v3078_v18 = vpop.f32.mrf.mxu3  ;;  %v3096_v54 = vsub.f32 1.0, %v3095_v51 }
 0x1ff   : > { %v3032_v26 = vpop.f32.mrf.mxu1 }
 0x200   : > { %v3033_v35 = vadd.f32 %v3032_v26, %v3009_v14  ;;  %v3056_v22 = vpop.f32.mrf.mxu2  ;;  %v3097_v56 = vmul.f32 %v6091_v30, %v3096_v54 }
 0x202   : > { %v3057_v48 = vadd.f32 %v3056_v22, %v3033_v35  ;;  %v3098_v15 = vadd.f32 %v6091_v30, %v3097_v56 }
 0x204   : > { %v3079_v7 = vadd.f32 %v3078_v18, %v3057_v48  ;;  %v6821_v59 = vsel %vm3099_vm14, %v6091_v30, %v3098_v15  ;;  %vm3146_vm14 = vcmask 64512   ;;  %v3130_v18 = vld [vmem:[%s7166_s2] sm:$0xff] }
 0x205   : > { %v3148_v26 = vsel %vm3146_vm14, %v6026_v25, 0  ;;  %v3453_v34 = vsel %vm3146_vm14, %v3130_v18, 0 }
 0x206   : > { %v3082_v28 = vadd.f32 %v3079_v7, %v2759_v53  ;;  %v6875_v44 = vand.u32 4294901760, %v3148_v26  ;;  %v6888_v7 = vand.u32 4294901760, %v3453_v34 }
 0x208   : > { %v3088_v0 = vsel %vm6809_vm13, %v3082_v28, 0.0  ;;  %v3168_v58 = vsub.f32 %v3148_v26, %v6875_v44  ;;  %v6893_v28 = vsub.f32 %v3453_v34, %v6888_v7 }
 0x209   : > { %v3090_v46 = vadd.f32 %v3088_v0, %v2120_v27 }
 0x20a   : > { %v3169_v5 = vand.u32 4294901760, %v3168_v58  ;;  %v6896_v0 = vand.u32 4294901760, %v6893_v28 }
 0x20b   : > { %v3091_v38 = vadd.f32 %v3090_v46, %v3089_v29 }
 0x20c   : > { %v3170_v35 = vsub.f32 %v3168_v58, %v3169_v5 }
 0x20d   : > { %3092 = vadd.xlane.f32.xlu0 %v3091_v38 }
 0x20e   : > { %v3171_v13 = vand.u32 4294901760, %v3170_v35 }
 0x280   : > { %v3093_v55 = vpop.xlane.xlu0 %3092 }
 0x281   : > { %v3101_v57 = vmul.f32 %v6821_v59, %v3093_v55  ;;  %v6027_v55 = vld [vmem:[%s7166_s2 + $0x30] sm:$0xff] }
 0x283   : > { %v3102_v60 = vsub.f32 %v3089_v29, %v3101_v57  ;;  %v3103_v61 = vsub.f32 %v3090_v46, %v3101_v57  ;;  %v3475_v29 = vsub.f32 %v6893_v28, %v6896_v0 }
 0x285   : > { %v3104_v2 = vmul.f32 %v3102_v60, %v3102_v60  ;;  %v3105_v36 = vmul.f32 %v3103_v61, %v3103_v61  ;;  %v3476_v56 = vand.u32 4294901760, %v3475_v29 }
 0x287   : > { %v3106_v39 = vadd.f32 %v3105_v36, %v3104_v2 }
 0x289   : > { %3107 = vadd.xlane.f32.xlu1 %v3106_v39 }
 0x2fc   : > { %v3108_v3 = vpop.xlane.xlu1 %3107 }
 0x2fd   : > { %v3109_v42 = vmul.f32 %v3108_v3, %v6821_v59 }
 0x2ff   : > { %v3110_v10 = vadd.f32 1e-05, %v3109_v42 }
 0x301   : > { %6092 = vrsqrt.f32 %v3110_v10  ;;  %vm3117_vm0 = vweird.f32 %v3110_v10 }
 0x307   : > { %v6093_v8 = vpop.eup %6092 }
 0x308   : > { %v3112_v12 = vmul.f32 %v6093_v8, %v3110_v10  ;;  %vm3118_vm15 = vweird.f32 %v6093_v8 }
 0x309   : > { %vm3119_vm3 = vmor %vm3117_vm0, %vm3118_vm15 }
 0x30a   : > { %v3113_v32 = vmul.f32 %v6093_v8, %v3112_v12 }
 0x30c   : > { %v3114_v62 = vmul.f32 0.5, %v3113_v32 }
 0x30e   : > { %v3115_v63 = vsub.f32 1.5, %v3114_v62 }
 0x310   : > { %v3116_v14 = vmul.f32 %v6093_v8, %v3115_v63 }
 0x312   : > { %v3120_v17 = vsel %vm3119_vm3, %v6093_v8, %v3116_v14 }
 0x313   : > { %v3121_v19 = vmul.f32 %v3120_v17, %v3102_v60  ;;  %v3122_v23 = vmul.f32 %v3120_v17, %v3103_v61  ;;  %v3766_v61 = vsel %vm3146_vm14, %v6027_v55, 0 }
 0x314   : > { %v6912_v8 = vand.u32 4294901760, %v3766_v61 }
 0x315   : > { %v6825_v24 = vmax.f32 %v3121_v19, 0.0  ;;  %v6827_v6 = vmax.f32 %v3122_v23, 0.0 }
 0x316   : > { %v3786_v63 = vsub.f32 %v3766_v61, %v6912_v8 }
 0x317   : > { %3757 = vrot.lane.b32.xlu1 %v6827_v6, %s6163_s4  ;;  %3755 = vrot.lane.b32.xlu0 %v6825_v24, %s6163_s4 }
 0x318   : > { %3138 = vrot.lane.b32.xlu2 %v6825_v24, %s6161_s29  ;;  %v3787_v26 = vand.u32 4294901760, %v3786_v63 }
 0x31f   : > { %4670 = vrot.lane.b32.xlu1 %v6825_v24, %s6165_s6  ;;  %4365 = vrot.lane.b32.xlu0 %v6825_v24, %s6164_s5 }
 0x320   : > { %3140 = vrot.lane.b32.xlu2 %v6827_v6, %s6161_s29  ;;  %s161_s29 = sand.u32 1, %s6150_s13  }
 0x321   : > { %s6015_s27 = sshll.u32 %s161_s29, 4 }
 0x327   : > { %4983 = vrot.lane.b32.xlu1 %v6825_v24, %s6166_s9  ;;  %4672 = vrot.lane.b32.xlu0 %v6827_v6, %s6165_s6 }
 0x328   : > { %3442 = vrot.lane.b32.xlu2 %v7242_v52, %s6162_s30 }
 0x32f   : > { %5288 = vrot.lane.b32.xlu1 %v7242_v52, %s6167_s17  ;;  %4985 = vrot.lane.b32.xlu0 %v6827_v6, %s6166_s9 }
 0x330   : > { %3444 = vrot.lane.b32.xlu2 %v6825_v24, %s6162_s30 }
 0x337   : > { %5595 = vrot.lane.b32.xlu1 %v6825_v24, %s6168_s24  ;;  %5290 = vrot.lane.b32.xlu0 %v6825_v24, %s6167_s17 }
 0x338   : > { %3446 = vrot.lane.b32.xlu2 %v6827_v6, %s6162_s30  ;;  %s6040_s30 = sshll.u32 %s6211_s16, 4  ;;  %s5936_s16 = scalar_lea.sflag [#allocation5], %s161_s29 }
 0x33f   : > { %5597 = vrot.lane.b32.xlu0 %v6827_v6, %s6168_s24 }
 0x340   : > { %3759 = vrot.lane.b32.xlu2 %v7242_v52, %s6163_s4 }
 0x348   : > { %4363 = vrot.lane.b32.xlu2 %v7242_v52, %s6164_s5 }
 0x350   : > { %4367 = vrot.lane.b32.xlu2 %v6827_v6, %s6164_s5 }
 0x358   : > { %4674 = vrot.lane.b32.xlu2 %v7242_v52, %s6165_s6  ;;  %s5947_s6 = scalar_lea.hbm %s7167_s3, %s6040_s30 }
 0x360   : > { %4987 = vrot.lane.b32.xlu2 %v7242_v52, %s6166_s9  ;;  %s163_s9 = scalar_lea.vmem [#allocation4], %s6015_s27 }
 0x368   : > { %5292 = vrot.lane.b32.xlu2 %v6827_v6, %s6167_s17  ;;  %s5949_s17 = sshll.u32 %s163_s9, 4  ;;  %s5950_s17 = int_to_ptr.vmem [resolvable:$true] %s5949_s17 }
 0x370   : > { %5599 = vrot.lane.b32.xlu2 %v7242_v52, %s6168_s24  ;;  %s5951_s24 = sshll.u32 %s5947_s6, 4  ;;  %s5952_s24 = int_to_ptr.hbm [resolvable:$true] %s5951_s24 }
 0x371   : > { %s6110_s28 = sshra.s32 %s5952_s24, 4  ;;  %s6111_s28 = int_to_ptr.hbm [resolvable:$true] %s6110_s28 }
 0x372   : > { %v3139_v22 = vpop.permute.xlu2 %3138  ;;  %s6112_s7 = scalar_lea.hbm %s6111_s28, 16  ;;  %p6117_p0 = scmp.lt.s32.totalorder %s6111_s28, %s7167_s3 }
 0x373   : > { %v3142_v37 = vsel %vm225_vm2, %v3137_v31, %v3139_v22  ;;  %p6113_p11 = scmp.ne.s32.totalorder %s6111_s28, %s6112_s7  ;;  %p6118_p1 = scmp.lt.s32.totalorder %s6116_s11, %s6112_s7 }
 0x374   : > { %v3165_v47 = vand.u32 4294901760, %v3142_v37 }
 0x375   : > { %p6114_p12 = pnand %p6113_p11, %p6228_p5  ;;  %p6119_p2 = por %p6118_p1, %p6117_p0 }
 0x376   : > { %v3192_v50 = vsub.f32 %v3142_v37, %v3165_v47  ;;  %3166 = vmatpush.msrb.mxu0 %v3165_v47  ;;  %3242 = vmatpush.msrb.mxu3 %v3165_v47 }
 0x377   : > { %3172 = vmatmul.f32.vlgmr.msrb.gmra.mxu0 %v3171_v13  ;;  %3246 = vmatmul.f32.vlgmr.msrb.gmra.mxu3 %v3169_v5  ;;  %p6115_p13 = pneg %p6114_p12 }
 0x378   : > { %v3193_v4 = vand.u32 4294901760, %v3192_v50  ;;  %3219 = vmatpush.msrb.mxu2 %v3192_v50 }
 0x379   : > { %3222 = vmatmul.f32.vlgmr.msrb.gmra.mxu2 %v3168_v58  ;;  %p6120_p3 = pnand %p6119_p2, %p6115_p13 }
 0x37a   : > { %v3194_v41 = vsub.f32 %v3192_v50, %v3193_v4  ;;  %3268 = vmatpush.msra.mxu0 %v3193_v4  ;;  %v3141_v48 = vpop.permute.xlu2 %3140 }
 0x37b   : > { %v3143_v9 = vsel %vm225_vm2, %v3139_v22, %v3141_v48 }
 0x37c   : > { %v3311_v16 = vand.u32 4294901760, %v3143_v9  ;;  %v3195_v53 = vand.u32 4294901760, %v3194_v41  ;;  %v4232_v41 = vand.u32 4294901760, %v6827_v6 }
 0x37e   : > { %v3338_v20 = vsub.f32 %v3143_v9, %v3311_v16  ;;  %3196 = vmatpush.msrb.mxu1 %v3195_v53  ;;  %3312 = vmatpush.msra.mxu2 %v3311_v16 }
 0x37f   : > { %3198 = vmatmul.f32.vlgmr.msrb.gmra.mxu1 %v6875_v44  ;;  %3270 = vmatmul.f32.vlgmr.msra.gmra.mxu0 %v6875_v44 }
 0x380   : > { %v3339_v43 = vand.u32 4294901760, %v3338_v20  ;;  %3290 = vmatpush.msra.mxu1 %v3165_v47  ;;  %3365 = vmatpush.msrb.mxu0 %v3338_v20  ;;  %v6029_v47 = vld [vmem:[%s7166_s2 + $0x20] sm:$0xff] }
 0x381   : > { %3318 = vmatmul.f32.vlgmr.msra.gmra.mxu2 %v3171_v13  ;;  %v4086_v13 = vand.u32 4294901760, %v6825_v24  ;;  %v4069_v50 = vsel %vm3146_vm14, %v6029_v47, 0 }
 0x382   : > { %3388 = vmatpush.msrb.mxu1 %v3311_v16  ;;  %v3340_v49 = vsub.f32 %v3338_v20, %v3339_v43  ;;  %3414 = vmatpush.msrb.mxu2 %v3339_v43  ;;  %v3443_v40 = vpop.permute.xlu2 %3442  ;;  %v6931_v4 = vand.u32 4294901760, %v4069_v50 }
 0x383   : > { %v4113_v18 = vsub.f32 %v6825_v24, %v4086_v13  ;;  %v4259_v24 = vsub.f32 %v6827_v6, %v4232_v41 }
 0x384   : > { %v3341_v27 = vand.u32 4294901760, %v3340_v49  ;;  %v4089_v48 = vsub.f32 %v4069_v50, %v6931_v4 }
 0x385   : > { %v4114_v34 = vand.u32 4294901760, %v4113_v18  ;;  %v4260_v20 = vand.u32 4294901760, %v4259_v24 }
 0x386   : > { %3342 = vmatpush.msra.mxu3 %v3341_v27 }
 0x387   : > { %3292 = vmatmul.f32.vlgmr.msra.gmra.mxu1 %v6875_v44  ;;  %3344 = vmatmul.f32.vlgmr.msra.gmra.mxu3 %v6875_v44  ;;  %v4115_v9 = vsub.f32 %v4113_v18, %v4114_v34  ;;  %v4261_v49 = vsub.f32 %v4259_v24, %v4260_v20 }
 0x388   : > { %3368 = vmatmul.f32.vlgmr.msrb.gmra.mxu0 %v3168_v58  ;;  %3436 = vmatpush.msrb.mxu3 %v3311_v16  ;;  %v6938_v16 = vand.u32 4294901760, %v4089_v48 }
 0x389   : > { %3416 = vmatmul.f32.vlgmr.msrb.gmra.mxu2 %v6875_v44  ;;  %v3758_v46 = vpop.permute.xlu1 %3757  ;;  %v3756_v38 = vpop.permute.xlu0 %3755  ;;  %v4116_v53 = vand.u32 4294901760, %v4115_v9  ;;  %v4262_v29 = vand.u32 4294901760, %v4261_v49 }
 0x38a   : > { %v3445_v21 = vpop.permute.xlu2 %3444  ;;  %v3761_v51 = vsel %vm861_vm4, %v3756_v38, %v3758_v46  ;;  %v4091_v43 = vsub.f32 %v4089_v48, %v6938_v16 }
 0x38b   : > { %v3448_v30 = vsel %vm541_vm1, %v3443_v40, %v3445_v21  ;;  %v3783_v57 = vand.u32 4294901760, %v3761_v51 }
 0x38c   : > { %v3470_v54 = vand.u32 4294901760, %v3448_v30  ;;  %v4092_v40 = vand.u32 4294901760, %v4091_v43 }
 0x38d   : > { %v3810_v39 = vsub.f32 %v3761_v51, %v3783_v57 }
 0x38e   : > { %v3497_v15 = vsub.f32 %v3448_v30, %v3470_v54  ;;  %3471 = vmatpush.msra.mxu0 %v3470_v54  ;;  %3547 = vmatpush.msra.mxu3 %v3470_v54 }
 0x38f   : > { %3392 = vmatmul.f32.vlgmr.msrb.gmra.mxu1 %v3169_v5  ;;  %3438 = vmatmul.f32.vlgmr.msrb.gmra.mxu3 %v6875_v44  ;;  %v3811_v32 = vand.u32 4294901760, %v3810_v39  ;;  %v3788_v5 = vsub.f32 %v3786_v63, %v3787_v26 }
 0x390   : > { %v3498_v60 = vand.u32 4294901760, %v3497_v15  ;;  %3477 = vmatmul.f32.vlgmr.msra.gmra.mxu0 %v3476_v56  ;;  %3524 = vmatpush.msra.mxu2 %v3497_v15 }
 0x391   : > { %3527 = vmatmul.f32.vlgmr.msra.gmra.mxu2 %v6893_v28  ;;  %v3812_v19 = vsub.f32 %v3810_v39, %v3811_v32  ;;  %v3789_v22 = vand.u32 4294901760, %v3788_v5 }
 0x392   : > { %v3499_v2 = vsub.f32 %v3497_v15, %v3498_v60  ;;  %3573 = vmatpush.msrb.mxu0 %v3498_v60  ;;  %v3447_v36 = vpop.permute.xlu2 %3446 }
 0x393   : > { %v3449_v3 = vsel %vm541_vm1, %v3445_v21, %v3447_v36  ;;  %v3813_v58 = vand.u32 4294901760, %v3812_v19 }
 0x394   : > { %v3616_v42 = vand.u32 4294901760, %v3449_v3  ;;  %v3500_v10 = vand.u32 4294901760, %v3499_v2 }
 0x396   : > { %v3643_v12 = vsub.f32 %v3449_v3, %v3616_v42  ;;  %3501 = vmatpush.msra.mxu1 %v3500_v10  ;;  %3617 = vmatpush.msrb.mxu2 %v3616_v42  ;;  %v4671_v3 = vpop.permute.xlu1 %4670 }
 0x397   : > { %3503 = vmatmul.f32.vlgmr.msra.gmra.mxu1 %v6888_v7  ;;  %3551 = vmatmul.f32.vlgmr.msra.gmra.mxu3 %v6896_v0 }
 0x398   : > { %v3644_v62 = vand.u32 4294901760, %v3643_v12  ;;  %3575 = vmatmul.f32.vlgmr.msrb.gmra.mxu0 %v6888_v7  ;;  %3595 = vmatpush.msrb.mxu1 %v3470_v54 }
 0x399   : > { %3670 = vmatpush.msra.mxu0 %v3643_v12  ;;  %3623 = vmatmul.f32.vlgmr.msrb.gmra.mxu2 %v3476_v56 }
 0x39a   : > { %3693 = vmatpush.msra.mxu1 %v3616_v42  ;;  %v3645_v14 = vsub.f32 %v3643_v12, %v3644_v62  ;;  %v3760_v17 = vpop.permute.xlu2 %3759  ;;  %3719 = vmatpush.msra.mxu2 %v3644_v62 }
 0x39b   : > { %3784 = vmatpush.msrb.mxu0 %v3783_v57  ;;  %v3762_v23 = vsel %vm861_vm4, %v3758_v46, %v3760_v17 }
 0x39c   : > { %v3929_v52 = vand.u32 4294901760, %v3762_v23  ;;  %3837 = vmatpush.msrb.mxu2 %v3810_v39  ;;  %v3646_v25 = vand.u32 4294901760, %v3645_v14 }
 0x39e   : > { %v3956_v44 = vsub.f32 %v3762_v23, %v3929_v52  ;;  %3647 = vmatpush.msrb.mxu3 %v3646_v25 }
 0x39f   : > { %3597 = vmatmul.f32.vlgmr.msrb.gmra.mxu1 %v6888_v7  ;;  %3649 = vmatmul.f32.vlgmr.msrb.gmra.mxu3 %v6888_v7 }
 0x3a0   : > { %v3957_v31 = vand.u32 4294901760, %v3956_v44  ;;  %3673 = vmatmul.f32.vlgmr.msra.gmra.mxu0 %v6893_v28  ;;  %3741 = vmatpush.msra.mxu3 %v3616_v42  ;;  %v4366_v28 = vpop.permute.xlu0 %4365 }
 0x3a1   : > { %3814 = vmatpush.msrb.mxu1 %v3813_v58  ;;  %3886 = vmatpush.msra.mxu0 %v3811_v32  ;;  %v6030_v32 = vld [vmem:[%s7166_s2 + $0x38] sm:$0xff] }
 0x3a2   : > { %v3958_v35 = vsub.f32 %v3956_v44, %v3957_v31  ;;  %3860 = vmatpush.msrb.mxu3 %v3783_v57  ;;  %3721 = vmatmul.f32.vlgmr.msra.gmra.mxu2 %v6888_v7  ;;  %v4681_v14 = vsel %vm3146_vm14, %v6030_v32, 0 }
 0x3a3   : > { %3930 = vmatpush.msra.mxu2 %v3929_v52  ;;  %v6971_v23 = vand.u32 4294901760, %v4681_v14 }
 0x3a4   : > { %v3959_v37 = vand.u32 4294901760, %v3958_v35 }
 0x3a7   : > { %3697 = vmatmul.f32.vlgmr.msra.gmra.mxu1 %v6896_v0  ;;  %3743 = vmatmul.f32.vlgmr.msra.gmra.mxu3 %v6888_v7  ;;  %v4364_v7 = vpop.permute.xlu2 %4363  ;;  %v6028_v0 = vld [vmem:[%s7166_s2 + $0x8] sm:$0xff] }
 0x3a8   : > { %3790 = vmatmul.f32.vlgmr.msrb.gmra.mxu0 %v3789_v22  ;;  %3908 = vmatpush.msra.mxu1 %v3783_v57  ;;  %v4369_v6 = vsel %vm1495_vm5, %v4364_v7, %v4366_v28  ;;  %v4374_v38 = vsel %vm3146_vm14, %v6028_v0, 0  ;;  %v4673_v36 = vpop.permute.xlu0 %4672 }
 0x3a9   : > { %3960 = vmatpush.msra.mxu3 %v3959_v37  ;;  %3983 = vmatpush.msrb.mxu0 %v3956_v44  ;;  %v4391_v27 = vand.u32 4294901760, %v4369_v6  ;;  %v6951_v51 = vand.u32 4294901760, %v4374_v38  ;;  %v4676_v42 = vsel %vm1815_vm6, %v4671_v3, %v4673_v36 }
 0x3aa   : > { %3840 = vmatmul.f32.vlgmr.msrb.gmra.mxu2 %v3786_v63  ;;  %v4698_v12 = vand.u32 4294901760, %v4676_v42 }
 0x3ab   : > { %4032 = vmatpush.msrb.mxu2 %v3957_v31  ;;  %v4418_v21 = vsub.f32 %v4369_v6, %v4391_v27  ;;  %v4394_v15 = vsub.f32 %v4374_v38, %v6951_v51 }
 0x3ac   : > { %v4725_v17 = vsub.f32 %v4676_v42, %v4698_v12 }
 0x3ad   : > { %v4419_v54 = vand.u32 4294901760, %v4418_v21  ;;  %v6957_v60 = vand.u32 4294901760, %v4394_v15 }
 0x3af   : > { %3816 = vmatmul.f32.vlgmr.msrb.gmra.mxu1 %v6912_v8  ;;  %3864 = vmatmul.f32.vlgmr.msrb.gmra.mxu3 %v3787_v26  ;;  %v4368_v46 = vpop.permute.xlu2 %4367  ;;  %v4420_v55 = vsub.f32 %v4418_v21, %v4419_v54  ;;  %v4396_v39 = vsub.f32 %v4394_v15, %v6957_v60 }
 0x3b0   : > { %3888 = vmatmul.f32.vlgmr.msra.gmra.mxu0 %v6912_v8  ;;  %4006 = vmatpush.msrb.mxu1 %v3929_v52  ;;  %v4370_v30 = vsel %vm1495_vm5, %v4366_v28, %v4368_v46 }
 0x3b1   : > { %4054 = vmatpush.msrb.mxu3 %v3929_v52  ;;  %4087 = vmatpush.msra.mxu0 %v4086_v13  ;;  %v4537_v56 = vand.u32 4294901760, %v4370_v30  ;;  %v4421_v61 = vand.u32 4294901760, %v4420_v55  ;;  %v4726_v52 = vand.u32 4294901760, %v4725_v17 }
 0x3b2   : > { %3936 = vmatmul.f32.vlgmr.msra.gmra.mxu2 %v3789_v22  ;;  %v4986_v22 = vpop.permute.xlu0 %4985 }
 0x3b3   : > { %4140 = vmatpush.msra.mxu2 %v4113_v18  ;;  %v4564_v57 = vsub.f32 %v4370_v30, %v4537_v56  ;;  %v4727_v44 = vsub.f32 %v4725_v17, %v4726_v52 }
 0x3b5   : > { %v4565_v2 = vand.u32 4294901760, %v4564_v57  ;;  %v4728_v5 = vand.u32 4294901760, %v4727_v44 }
 0x3b7   : > { %3910 = vmatmul.f32.vlgmr.msra.gmra.mxu1 %v6912_v8  ;;  %3962 = vmatmul.f32.vlgmr.msra.gmra.mxu3 %v6912_v8  ;;  %v4566_v10 = vsub.f32 %v4564_v57, %v4565_v2 }
 0x3b8   : > { %3986 = vmatmul.f32.vlgmr.msrb.gmra.mxu0 %v3786_v63  ;;  %4117 = vmatpush.msra.mxu1 %v4116_v53  ;;  %v4675_v63 = vpop.permute.xlu2 %4674 }
 0x3b9   : > { %4163 = vmatpush.msra.mxu3 %v4086_v13  ;;  %4189 = vmatpush.msrb.mxu0 %v4114_v34  ;;  %v4567_v62 = vand.u32 4294901760, %v4566_v10  ;;  %v4677_v19 = vsel %vm1815_vm6, %v4673_v36, %v4675_v63  ;;  %v6032_v34 = vld [vmem:[%s7166_s2 + $0x28] sm:$0xff]  ;;  %v6031_v10 = vld [vmem:[%s7166_s2 + $0x10] sm:$0xff] }
 0x3ba   : > { %4034 = vmatmul.f32.vlgmr.msrb.gmra.mxu2 %v6912_v8  ;;  %v4844_v25 = vand.u32 4294901760, %v4677_v19  ;;  %v4994_v9 = vsel %vm3146_vm14, %v6032_v34, 0  ;;  %v5299_v32 = vsel %vm3146_vm14, %v6031_v10, 0 }
 0x3bb   : > { %4233 = vmatpush.msrb.mxu2 %v4232_v41  ;;  %v6999_v7 = vand.u32 4294901760, %v4994_v9 }
 0x3bc   : > { %v4871_v58 = vsub.f32 %v4677_v19, %v4844_v25 }
 0x3bd   : > { %v7007_v28 = vsub.f32 %v4994_v9, %v6999_v7 }
 0x3be   : > { %v4872_v35 = vand.u32 4294901760, %v4871_v58 }
 0x3bf   : > { %4010 = vmatmul.f32.vlgmr.msrb.gmra.mxu1 %v3787_v26  ;;  %4056 = vmatmul.f32.vlgmr.msrb.gmra.mxu3 %v6912_v8  ;;  %v4397_v8 = vand.u32 4294901760, %v4396_v39  ;;  %v6977_v26 = vsub.f32 %v4681_v14, %v6971_v23  ;;  %v7012_v0 = vand.u32 4294901760, %v7007_v28 }
 0x3c0   : > { %4093 = vmatmul.f32.vlgmr.msra.gmra.mxu0 %v4092_v40  ;;  %4211 = vmatpush.msrb.mxu1 %v4086_v13  ;;  %v4984_v13 = vpop.permute.xlu1 %4983  ;;  %v4873_v50 = vsub.f32 %v4871_v58, %v4872_v35 }
 0x3c1   : > { %4263 = vmatpush.msrb.mxu3 %v4262_v29  ;;  %4286 = vmatpush.msra.mxu0 %v4259_v24  ;;  %v6980_v31 = vand.u32 4294901760, %v6977_v26  ;;  %v4989_v47 = vsel %vm2143_vm7, %v4984_v13, %v4986_v22 }
 0x3c2   : > { %4143 = vmatmul.f32.vlgmr.msra.gmra.mxu2 %v4089_v48 }
 0x3c3   : > { %4335 = vmatpush.msra.mxu2 %v4260_v20  ;;  %v4703_v37 = vsub.f32 %v6977_v26, %v6980_v31 }
 0x3c5   : > { %v4704_v18 = vand.u32 4294901760, %v4703_v37 }
 0x3c7   : > { %4119 = vmatmul.f32.vlgmr.msra.gmra.mxu1 %v6931_v4  ;;  %4167 = vmatmul.f32.vlgmr.msra.gmra.mxu3 %v6938_v16 }
 0x3c8   : > { %4191 = vmatmul.f32.vlgmr.msrb.gmra.mxu0 %v6931_v4  ;;  %4309 = vmatpush.msra.mxu1 %v4232_v41  ;;  %v5289_v55 = vpop.permute.xlu1 %5288 }
 0x3c9   : > { %4357 = vmatpush.msra.mxu3 %v4232_v41  ;;  %4392 = vmatpush.msrb.mxu0 %v4391_v27  ;;  %v4874_v41 = vand.u32 4294901760, %v4873_v50 }
 0x3ca   : > { %4239 = vmatmul.f32.vlgmr.msrb.gmra.mxu2 %v4092_v40 }
 0x3cb   : > { %4445 = vmatpush.msrb.mxu2 %v4418_v21 }
 0x3cf   : > { %4213 = vmatmul.f32.vlgmr.msrb.gmra.mxu1 %v6931_v4  ;;  %4265 = vmatmul.f32.vlgmr.msrb.gmra.mxu3 %v6931_v4 }
 0x3d0   : > { %4289 = vmatmul.f32.vlgmr.msra.gmra.mxu0 %v4089_v48  ;;  %4422 = vmatpush.msrb.mxu1 %v4421_v61  ;;  %v4988_v48 = vpop.permute.xlu2 %4987 }
 0x3d1   : > { %4468 = vmatpush.msrb.mxu3 %v4391_v27  ;;  %4494 = vmatpush.msra.mxu0 %v4419_v54  ;;  %v5291_v54 = vpop.permute.xlu0 %5290 }
 0x3d2   : > { %4337 = vmatmul.f32.vlgmr.msra.gmra.mxu2 %v6931_v4 }
 0x3d3   : > { %4538 = vmatpush.msra.mxu2 %v4537_v56 }
 0x3d7   : > { %4313 = vmatmul.f32.vlgmr.msra.gmra.mxu1 %v6938_v16  ;;  %4359 = vmatmul.f32.vlgmr.msra.gmra.mxu3 %v6931_v4  ;;  %v6988_v4 = vand.u32 4294901760, %v4989_v47  ;;  %v4990_v16 = vsel %vm2143_vm7, %v4986_v22, %v4988_v48 }
 0x3d8   : > { %4398 = vmatmul.f32.vlgmr.msrb.gmra.mxu0 %v4397_v8  ;;  %4516 = vmatpush.msra.mxu1 %v4391_v27  ;;  %v7001_v43 = vand.u32 4294901760, %v4990_v16 }
 0x3d9   : > { %4568 = vmatpush.msra.mxu3 %v4567_v62  ;;  %4591 = vmatpush.msrb.mxu0 %v4564_v57  ;;  %v5038_v24 = vsub.f32 %v4989_v47, %v6988_v4  ;;  %v5294_v57 = vsel %vm2459_vm8, %v5289_v55, %v5291_v54 }
 0x3da   : > { %4448 = vmatmul.f32.vlgmr.msrb.gmra.mxu2 %v4394_v15  ;;  %v5184_v49 = vsub.f32 %v4990_v16, %v7001_v43  ;;  %v7023_v42 = vand.u32 4294901760, %v5294_v57 }
 0x3db   : > { %4640 = vmatpush.msrb.mxu2 %v4565_v2  ;;  %v5039_v20 = vand.u32 4294901760, %v5038_v24 }
 0x3dc   : > { %v5185_v30 = vand.u32 4294901760, %v5184_v49  ;;  %v5343_v62 = vsub.f32 %v5294_v57, %v7023_v42 }
 0x3dd   : > { %v5040_v6 = vsub.f32 %v5038_v24, %v5039_v20 }
 0x3df   : > { %4424 = vmatmul.f32.vlgmr.msrb.gmra.mxu1 %v6951_v51  ;;  %4472 = vmatmul.f32.vlgmr.msrb.gmra.mxu3 %v6957_v60  ;;  %v5041_v38 = vand.u32 4294901760, %v5040_v6  ;;  %v5596_v6 = vpop.permute.xlu1 %5595 }
 0x3e0   : > { %4496 = vmatmul.f32.vlgmr.msra.gmra.mxu0 %v6951_v51  ;;  %4614 = vmatpush.msrb.mxu1 %v4537_v56 }
 0x3e1   : > { %4662 = vmatpush.msrb.mxu3 %v4537_v56  ;;  %4699 = vmatpush.msra.mxu0 %v4698_v12  ;;  %v5016_v56 = vsub.f32 %v7007_v28, %v7012_v0 }
 0x3e2   : > { %4544 = vmatmul.f32.vlgmr.msra.gmra.mxu2 %v4397_v8 }
 0x3e3   : > { %4752 = vmatpush.msra.mxu2 %v4725_v17  ;;  %v5017_v39 = vand.u32 4294901760, %v5016_v56  ;;  %v6033_v56 = vld [vmem:[%s7166_s2 + $0x40] sm:$0xff] }
 0x3e7   : > { %4518 = vmatmul.f32.vlgmr.msra.gmra.mxu1 %v6951_v51  ;;  %4570 = vmatmul.f32.vlgmr.msra.gmra.mxu3 %v6951_v51 }
 0x3e8   : > { %4594 = vmatmul.f32.vlgmr.msrb.gmra.mxu0 %v4394_v15  ;;  %4729 = vmatpush.msra.mxu1 %v4728_v5 }
 0x3e9   : > { %4775 = vmatpush.msra.mxu3 %v4698_v12  ;;  %4801 = vmatpush.msrb.mxu0 %v4726_v52 }
 0x3ea   : > { %4642 = vmatmul.f32.vlgmr.msrb.gmra.mxu2 %v6951_v51 }
 0x3eb   : > { %4845 = vmatpush.msrb.mxu2 %v4844_v25 }
 0x3ef   : > { %4618 = vmatmul.f32.vlgmr.msrb.gmra.mxu1 %v6957_v60  ;;  %4664 = vmatmul.f32.vlgmr.msrb.gmra.mxu3 %v6951_v51  ;;  %v5186_v60 = vsub.f32 %v5184_v49, %v5185_v30 }
 0x3f0   : > { %4705 = vmatmul.f32.vlgmr.msra.gmra.mxu0 %v4704_v18  ;;  %4823 = vmatpush.msrb.mxu1 %v4698_v12  ;;  %v5293_v12 = vpop.permute.xlu2 %5292 }
 0x3f1   : > { %4875 = vmatpush.msrb.mxu3 %v4874_v41  ;;  %4898 = vmatpush.msra.mxu0 %v4871_v58  ;;  %v5187_v8 = vand.u32 4294901760, %v5186_v60  ;;  %v5295_v17 = vsel %vm2459_vm8, %v5291_v54, %v5293_v12  ;;  %v5344_v58 = vand.u32 4294901760, %v5343_v62  ;;  %v5606_v60 = vsel %vm3146_vm14, %v6033_v56, 0 }
 0x3f2   : > { %4755 = vmatmul.f32.vlgmr.msra.gmra.mxu2 %v6977_v26  ;;  %v7037_v5 = vand.u32 4294901760, %v5295_v17 }
 0x3f3   : > { %4947 = vmatpush.msra.mxu2 %v4872_v35  ;;  %v5345_v13 = vsub.f32 %v5343_v62, %v5344_v58 }
 0x3f4   : > { %v3173_v53 = vpop.f32.mrf.mxu0  ;;  %v5489_v50 = vsub.f32 %v5295_v17, %v7037_v5 }
 0x3f6   : > { %v5490_v16 = vand.u32 4294901760, %v5489_v50 }
 0x3f7   : > { %4731 = vmatmul.f32.vlgmr.msra.gmra.mxu1 %v6971_v23  ;;  %4779 = vmatmul.f32.vlgmr.msra.gmra.mxu3 %v6980_v31 }
 0x3f8   : > { %4803 = vmatmul.f32.vlgmr.msrb.gmra.mxu0 %v6971_v23  ;;  %4921 = vmatpush.msra.mxu1 %v4844_v25  ;;  %v5600_v57 = vpop.permute.xlu2 %5599 }
 0x3f9   : > { %4969 = vmatpush.msra.mxu3 %v4844_v25  ;;  %5012 = vmatpush.msrb.mxu0 %v6988_v4  ;;  %v7035_v25 = vand.u32 4294901760, %v5299_v32 }
 0x3fa   : > { %4851 = vmatmul.f32.vlgmr.msrb.gmra.mxu2 %v4704_v18  ;;  %v3247_v21 = vpop.f32.mrf.mxu3 }
 0x3fb   : > { %5065 = vmatpush.msrb.mxu2 %v5038_v24  ;;  %v7044_v22 = vsub.f32 %v5299_v32, %v7035_v25  ;;  %v5346_v24 = vand.u32 4294901760, %v5345_v13 }
 0x3fc   : > { %v3199_v40 = vpop.f32.mrf.mxu1  ;;  %v3223_v27 = vpop.f32.mrf.mxu2 }
 0x3fd   : > { %v3200_v29 = vadd.f32 %v3199_v40, %v3173_v53  ;;  %v3271_v46 = vpop.f32.mrf.mxu0  ;;  %v7050_v41 = vand.u32 4294901760, %v7044_v22 }
 0x3ff   : > { %v3224_v51 = vadd.f32 %v3223_v27, %v3200_v29  ;;  %4825 = vmatmul.f32.vlgmr.msrb.gmra.mxu1 %v6971_v23  ;;  %4877 = vmatmul.f32.vlgmr.msrb.gmra.mxu3 %v6971_v23  ;;  %v5491_v27 = vsub.f32 %v5489_v50, %v5490_v16 }
 0x400   : > { %4901 = vmatmul.f32.vlgmr.msra.gmra.mxu0 %v6977_v26  ;;  %5042 = vmatpush.msrb.mxu1 %v5041_v38 }
 0x401   : > { %5088 = vmatpush.msrb.mxu3 %v6988_v4  ;;  %5114 = vmatpush.msra.mxu0 %v5039_v20  ;;  %v3248_v15 = vadd.f32 %v3247_v21, %v3224_v51  ;;  %v5598_v20 = vpop.permute.xlu0 %5597  ;;  %v5492_v55 = vand.u32 4294901760, %v5491_v27 }
 0x402   : > { %4949 = vmatmul.f32.vlgmr.msra.gmra.mxu2 %v6971_v23  ;;  %v5601_v40 = vsel %vm2779_vm9, %v5596_v6, %v5598_v20 }
 0x403   : > { %5158 = vmatpush.msra.mxu2 %v7001_v43  ;;  %v3272_v61 = vadd.f32 %v3271_v46, %v3248_v15  ;;  %v7061_v51 = vand.u32 4294901760, %v5601_v40 }
 0x404   : > { %v3293_v2 = vpop.f32.mrf.mxu1  ;;  %v3319_v36 = vpop.f32.mrf.mxu2 }
 0x405   : > { %v3369_v3 = vpop.f32.mrf.mxu0  ;;  %v3294_v19 = vadd.f32 %v3293_v2, %v3272_v61  ;;  %v5650_v61 = vsub.f32 %v5601_v40, %v7061_v51 }
 0x407   : > { %4925 = vmatmul.f32.vlgmr.msra.gmra.mxu1 %v6980_v31  ;;  %4971 = vmatmul.f32.vlgmr.msra.gmra.mxu3 %v6971_v23 }
 0x408   : > { %5018 = vmatmul.f32.vlgmr.msrb.gmra.mxu0 %v5017_v39  ;;  %5136 = vmatpush.msra.mxu1 %v6988_v4 }
 0x409   : > { %5188 = vmatpush.msra.mxu3 %v5187_v8  ;;  %5211 = vmatpush.msrb.mxu0 %v5184_v49  ;;  %v5651_v8 = vand.u32 4294901760, %v5650_v61 }
 0x40a   : > { %5068 = vmatmul.f32.vlgmr.msrb.gmra.mxu2 %v7007_v28  ;;  %v3345_v63 = vpop.f32.mrf.mxu3 }
 0x40b   : > { %5260 = vmatpush.msrb.mxu2 %v5185_v30  ;;  %v3346_v14 = vadd.f32 %v3345_v63, %v3319_v36 }
 0x40c   : > { %v3393_v23 = vpop.f32.mrf.mxu1  ;;  %v3417_v52 = vpop.f32.mrf.mxu2 }
 0x40d   : > { %v3370_v26 = vadd.f32 %v3369_v3, %v3346_v14  ;;  %v3478_v44 = vpop.f32.mrf.mxu0  ;;  %v5652_v14 = vsub.f32 %v5650_v61, %v5651_v8 }
 0x40e   : > { %v3479_v31 = vadd.f32 %v3478_v44, %v3294_v19 }
 0x40f   : > { %v3394_v35 = vadd.f32 %v3393_v23, %v3370_v26  ;;  %5044 = vmatmul.f32.vlgmr.msrb.gmra.mxu1 %v6999_v7  ;;  %5092 = vmatmul.f32.vlgmr.msrb.gmra.mxu3 %v7012_v0 }
 0x410   : > { %5116 = vmatmul.f32.vlgmr.msra.gmra.mxu0 %v6999_v7  ;;  %5234 = vmatpush.msrb.mxu1 %v7001_v43 }
 0x411   : > { %v3418_v37 = vadd.f32 %v3417_v52, %v3394_v35  ;;  %5282 = vmatpush.msrb.mxu3 %v7001_v43  ;;  %5317 = vmatpush.msra.mxu0 %v7023_v42  ;;  %v5321_v43 = vsub.f32 %v7044_v22, %v7050_v41  ;;  %v5653_v35 = vand.u32 4294901760, %v5652_v14 }
 0x412   : > { %5164 = vmatmul.f32.vlgmr.msra.gmra.mxu2 %v5017_v39  ;;  %v3439_v47 = vpop.f32.mrf.mxu3 }
 0x413   : > { %5370 = vmatpush.msra.mxu2 %v5343_v62  ;;  %v3440_v18 = vadd.f32 %v3439_v47, %v3418_v37  ;;  %v5322_v38 = vand.u32 4294901760, %v5321_v43 }
 0x414   : > { %v3504_v4 = vpop.f32.mrf.mxu1  ;;  %v3528_v34 = vpop.f32.mrf.mxu2 }
 0x415   : > { %v3505_v48 = vadd.f32 %v3504_v4, %v3479_v31  ;;  %v3576_v9 = vpop.f32.mrf.mxu0 }
 0x417   : > { %v3529_v53 = vadd.f32 %v3528_v34, %v3505_v48  ;;  %5138 = vmatmul.f32.vlgmr.msra.gmra.mxu1 %v6999_v7  ;;  %5190 = vmatmul.f32.vlgmr.msra.gmra.mxu3 %v6999_v7 }
 0x418   : > { %5214 = vmatmul.f32.vlgmr.msrb.gmra.mxu0 %v7007_v28  ;;  %5347 = vmatpush.msra.mxu1 %v5346_v24 }
 0x419   : > { %5393 = vmatpush.msra.mxu3 %v7023_v42  ;;  %5419 = vmatpush.msrb.mxu0 %v5344_v58 }
 0x41a   : > { %5262 = vmatmul.f32.vlgmr.msrb.gmra.mxu2 %v6999_v7  ;;  %v3552_v49 = vpop.f32.mrf.mxu3 }
 0x41b   : > { %5463 = vmatpush.msrb.mxu2 %v7037_v5  ;;  %v3553_v29 = vadd.f32 %v3552_v49, %v3529_v53 }
 0x41c   : > { %v3598_v46 = vpop.f32.mrf.mxu1  ;;  %v3624_v21 = vpop.f32.mrf.mxu2 }
 0x41d   : > { %v3577_v28 = vadd.f32 %v3576_v9, %v3553_v29  ;;  %v3674_v30 = vpop.f32.mrf.mxu0  ;;  %v3625_v54 = vadd.f32 %v3624_v21, %v3440_v18 }
 0x41f   : > { %v7066_v15 = vadd.f32 %v3598_v46, %v3577_v28  ;;  %5238 = vmatmul.f32.vlgmr.msrb.gmra.mxu1 %v7012_v0  ;;  %5284 = vmatmul.f32.vlgmr.msrb.gmra.mxu3 %v6999_v7  ;;  %v5602_v0 = vsel %vm2779_vm9, %v5598_v20, %v5600_v57  ;;  %v7075_v7 = vand.u32 4294901760, %v5606_v60 }
 0x420   : > { %5323 = vmatmul.f32.vlgmr.msra.gmra.mxu0 %v5322_v38  ;;  %5441 = vmatpush.msrb.mxu1 %v7023_v42  ;;  %v5769_v12 = vand.u32 4294901760, %v5602_v0 }
 0x421   : > { %5493 = vmatpush.msrb.mxu3 %v5492_v55  ;;  %5516 = vmatpush.msra.mxu0 %v5489_v50  ;;  %v7082_v62 = vsub.f32 %v5606_v60, %v7075_v7 }
 0x422   : > { %5373 = vmatmul.f32.vlgmr.msra.gmra.mxu2 %v7044_v22  ;;  %v3650_v2 = vpop.f32.mrf.mxu3  ;;  %v5796_v19 = vsub.f32 %v5602_v0, %v5769_v12 }
 0x423   : > { %5565 = vmatpush.msra.mxu2 %v5490_v16  ;;  %v3651_v36 = vadd.f32 %v3650_v2, %v3625_v54  ;;  %v7087_v26 = vand.u32 4294901760, %v7082_v62 }
 0x424   : > { %v3698_v39 = vpop.f32.mrf.mxu1  ;;  %v5797_v37 = vand.u32 4294901760, %v5796_v19 }
 0x425   : > { %v3675_v3 = vadd.f32 %v3674_v30, %v3651_v36  ;;  %v3722_v10 = vpop.f32.mrf.mxu2  ;;  %v3791_v42 = vpop.f32.mrf.mxu0 }
 0x426   : > { %v5798_v50 = vsub.f32 %v5796_v19, %v5797_v37 }
 0x427   : > { %v3699_v32 = vadd.f32 %v3698_v39, %v3675_v3  ;;  %5349 = vmatmul.f32.vlgmr.msra.gmra.mxu1 %v7035_v25  ;;  %5397 = vmatmul.f32.vlgmr.msra.gmra.mxu3 %v7050_v41 }
 0x428   : > { %5421 = vmatmul.f32.vlgmr.msrb.gmra.mxu0 %v7035_v25  ;;  %5539 = vmatpush.msra.mxu1 %v7037_v5 }
 0x429   : > { %v3723_v63 = vadd.f32 %v3722_v10, %v3699_v32  ;;  %5587 = vmatpush.msra.mxu3 %v7037_v5  ;;  %5624 = vmatpush.msrb.mxu0 %v7061_v51  ;;  %v5628_v5 = vsub.f32 %v7082_v62, %v7087_v26 }
 0x42a   : > { %5469 = vmatmul.f32.vlgmr.msrb.gmra.mxu2 %v5322_v38  ;;  %v3744_v17 = vpop.f32.mrf.mxu3 }
 0x42b   : > { %5677 = vmatpush.msrb.mxu2 %v5650_v61  ;;  %v3745_v23 = vadd.f32 %v3744_v17, %v3723_v63  ;;  %v5629_v34 = vand.u32 4294901760, %v5628_v5 }
 0x42c   : > { %v3817_v52 = vpop.f32.mrf.mxu1 }
 0x42d   : > { %v3818_v44 = vadd.f32 %v3817_v52, %v3791_v42  ;;  %v3841_v58 = vpop.f32.mrf.mxu2  ;;  %v3889_v31 = vpop.f32.mrf.mxu0 }
 0x42f   : > { %v3842_v13 = vadd.f32 %v3841_v58, %v3818_v44  ;;  %5443 = vmatmul.f32.vlgmr.msrb.gmra.mxu1 %v7035_v25  ;;  %5495 = vmatmul.f32.vlgmr.msrb.gmra.mxu3 %v7035_v25 }
 0x430   : > { %5519 = vmatmul.f32.vlgmr.msra.gmra.mxu0 %v7044_v22  ;;  %5654 = vmatpush.msrb.mxu1 %v5653_v35  ;;  %v5799_v22 = vand.u32 4294901760, %v5798_v50 }
 0x431   : > { %5700 = vmatpush.msrb.mxu3 %v7061_v51  ;;  %5726 = vmatpush.msra.mxu0 %v5651_v8 }
 0x432   : > { %5567 = vmatmul.f32.vlgmr.msra.gmra.mxu2 %v7035_v25  ;;  %v3865_v47 = vpop.f32.mrf.mxu3 }
 0x433   : > { %5770 = vmatpush.msra.mxu2 %v5769_v12  ;;  %v3866_v18 = vadd.f32 %v3865_v47, %v3842_v13 }
 0x434   : > { %v3911_v4 = vpop.f32.mrf.mxu1 }
 0x435   : > { %v3890_v48 = vadd.f32 %v3889_v31, %v3866_v18  ;;  %v3937_v9 = vpop.f32.mrf.mxu2  ;;  %v3987_v24 = vpop.f32.mrf.mxu0 }
 0x437   : > { %v3912_v16 = vadd.f32 %v3911_v4, %v3890_v48  ;;  %5543 = vmatmul.f32.vlgmr.msra.gmra.mxu1 %v7050_v41  ;;  %5589 = vmatmul.f32.vlgmr.msra.gmra.mxu3 %v7035_v25 }
 0x438   : > { %5630 = vmatmul.f32.vlgmr.msrb.gmra.mxu0 %v5629_v34  ;;  %5748 = vmatpush.msra.mxu1 %v7061_v51 }
 0x439   : > { %v7100_v53 = vadd.f32 %v3912_v16, %v7066_v15  ;;  %5800 = vmatpush.msra.mxu3 %v5799_v22  ;;  %5823 = vmatpush.msrb.mxu0 %v5796_v19 }
 0x43a   : > { %5680 = vmatmul.f32.vlgmr.msrb.gmra.mxu2 %v7082_v62  ;;  %v3963_v20 = vpop.f32.mrf.mxu3 }
 0x43b   : > { %5872 = vmatpush.msrb.mxu2 %v5797_v37  ;;  %v3964_v43 = vadd.f32 %v3963_v20, %v3937_v9 }
 0x43c   : > { %v4011_v6 = vpop.f32.mrf.mxu1 }
 0x43d   : > { %v3988_v49 = vadd.f32 %v3987_v24, %v3964_v43  ;;  %v4035_v40 = vpop.f32.mrf.mxu2  ;;  %v4094_v41 = vpop.f32.mrf.mxu0 }
 0x43f   : > { %v4012_v27 = vadd.f32 %v4011_v6, %v3988_v49  ;;  %5656 = vmatmul.f32.vlgmr.msrb.gmra.mxu1 %v7075_v7  ;;  %5704 = vmatmul.f32.vlgmr.msrb.gmra.mxu3 %v7087_v26 }
 0x440   : > { %5846 = vmatpush.msrb.mxu1 %v5769_v12  ;;  %5894 = vmatpush.msrb.mxu3 %v5769_v12 }
 0x441   : > { %v4036_v25 = vadd.f32 %v4035_v40, %v4012_v27  ;;  %5728 = vmatmul.f32.vlgmr.msra.gmra.mxu0 %v7075_v7 }
 0x442   : > { %v4057_v29 = vpop.f32.mrf.mxu3  ;;  %5776 = vmatmul.f32.vlgmr.msra.gmra.mxu2 %v5629_v34 }
 0x443   : > { %v4058_v46 = vadd.f32 %v4057_v29, %v4036_v25 }
 0x444   : > { %v4120_v38 = vpop.f32.mrf.mxu1 }
 0x445   : > { %v7106_v28 = vadd.f32 %v4058_v46, %v3745_v23  ;;  %v4121_v21 = vadd.f32 %v4120_v38, %v4094_v41  ;;  %v4144_v30 = vpop.f32.mrf.mxu2  ;;  %v4192_v51 = vpop.f32.mrf.mxu0 }
 0x447   : > { %v4145_v54 = vadd.f32 %v4144_v30, %v4121_v21  ;;  %5802 = vmatmul.f32.vlgmr.msra.gmra.mxu3 %v7075_v7  ;;  %5750 = vmatmul.f32.vlgmr.msra.gmra.mxu1 %v7075_v7  ;;  %v4062_v30 = vsel %vm6794_vm10, %v7100_v53, 0.0  ;;  %v4063_v33 = vsel %vm6800_vm11, %v7106_v28, 0.0 }
 0x449   : > { %5826 = vmatmul.f32.vlgmr.msrb.gmra.mxu0 %v7082_v62 }
 0x44a   : > { %v4168_v56 = vpop.f32.mrf.mxu3  ;;  %5874 = vmatmul.f32.vlgmr.msrb.gmra.mxu2 %v7075_v7 }
 0x44b   : > { %v4169_v15 = vadd.f32 %v4168_v56, %v4145_v54 }
 0x44c   : > { %v4214_v55 = vpop.f32.mrf.mxu1 }
 0x44d   : > { %v4193_v57 = vadd.f32 %v4192_v51, %v4169_v15  ;;  %v4240_v60 = vpop.f32.mrf.mxu2  ;;  %v4290_v61 = vpop.f32.mrf.mxu0 }
 0x44f   : > { %v4215_v2 = vadd.f32 %v4214_v55, %v4193_v57  ;;  %5896 = vmatmul.f32.vlgmr.msrb.gmra.mxu3 %v7075_v7  ;;  %5850 = vmatmul.f32.vlgmr.msrb.gmra.mxu1 %v7087_v26 }
 0x452   : > { %v4266_v36 = vpop.f32.mrf.mxu3 }
 0x453   : > { %v4267_v0 = vadd.f32 %v4266_v36, %v4240_v60 }
 0x454   : > { %v4314_v39 = vpop.f32.mrf.mxu1 }
 0x455   : > { %v4291_v3 = vadd.f32 %v4290_v61, %v4267_v0  ;;  %v4338_v10 = vpop.f32.mrf.mxu2  ;;  %v4399_v42 = vpop.f32.mrf.mxu0 }
 0x456   : > { %v4400_v8 = vadd.f32 %v4399_v42, %v4215_v2 }
 0x457   : > { %v4315_v12 = vadd.f32 %v4314_v39, %v4291_v3 }
 0x459   : > { %v4339_v32 = vadd.f32 %v4338_v10, %v4315_v12 }
 0x45a   : > { %v4360_v62 = vpop.f32.mrf.mxu3 }
 0x45b   : > { %v4361_v63 = vadd.f32 %v4360_v62, %v4339_v32 }
 0x45c   : > { %v4425_v14 = vpop.f32.mrf.mxu1 }
 0x45d   : > { %v4426_v17 = vadd.f32 %v4425_v14, %v4400_v8  ;;  %v4449_v19 = vpop.f32.mrf.mxu2  ;;  %v4497_v23 = vpop.f32.mrf.mxu0 }
 0x45f   : > { %v4450_v52 = vadd.f32 %v4449_v19, %v4426_v17 }
 0x462   : > { %v4473_v44 = vpop.f32.mrf.mxu3 }
 0x463   : > { %v4474_v7 = vadd.f32 %v4473_v44, %v4450_v52 }
 0x464   : > { %v4519_v58 = vpop.f32.mrf.mxu1 }
 0x465   : > { %v4498_v26 = vadd.f32 %v4497_v23, %v4474_v7  ;;  %v4545_v31 = vpop.f32.mrf.mxu2  ;;  %v4595_v35 = vpop.f32.mrf.mxu0 }
 0x466   : > { %v4546_v37 = vadd.f32 %v4545_v31, %v4361_v63 }
 0x467   : > { %v4520_v13 = vadd.f32 %v4519_v58, %v4498_v26 }
 0x46a   : > { %v4571_v5 = vpop.f32.mrf.mxu3 }
 0x46b   : > { %v4572_v47 = vadd.f32 %v4571_v5, %v4546_v37 }
 0x46c   : > { %v4619_v50 = vpop.f32.mrf.mxu1 }
 0x46d   : > { %v4596_v18 = vadd.f32 %v4595_v35, %v4572_v47  ;;  %v4643_v4 = vpop.f32.mrf.mxu2  ;;  %v4706_v34 = vpop.f32.mrf.mxu0 }
 0x46f   : > { %v4620_v48 = vadd.f32 %v4619_v50, %v4596_v18 }
 0x471   : > { %v4644_v9 = vadd.f32 %v4643_v4, %v4620_v48 }
 0x472   : > { %v4665_v24 = vpop.f32.mrf.mxu3 }
 0x473   : > { %v4666_v16 = vadd.f32 %v4665_v24, %v4644_v9 }
 0x474   : > { %v4732_v22 = vpop.f32.mrf.mxu1 }
 0x475   : > { %v4733_v20 = vadd.f32 %v4732_v22, %v4706_v34  ;;  %v4756_v43 = vpop.f32.mrf.mxu2  ;;  %v4804_v6 = vpop.f32.mrf.mxu0 }
 0x477   : > { %v4757_v49 = vadd.f32 %v4756_v43, %v4733_v20 }
 0x47a   : > { %v4780_v40 = vpop.f32.mrf.mxu3 }
 0x47b   : > { %v4781_v41 = vadd.f32 %v4780_v40, %v4757_v49 }
 0x47c   : > { %v4826_v27 = vpop.f32.mrf.mxu1 }
 0x47d   : > { %v4805_v25 = vadd.f32 %v4804_v6, %v4781_v41  ;;  %v4852_v29 = vpop.f32.mrf.mxu2  ;;  %v4902_v46 = vpop.f32.mrf.mxu0 }
 0x47f   : > { %v4827_v38 = vadd.f32 %v4826_v27, %v4805_v25 }
 0x481   : > { %v4975_v21 = vadd.f32 %v4827_v38, %v4520_v13 }
 0x482   : > { %v4878_v51 = vpop.f32.mrf.mxu3 }
 0x483   : > { %v7117_v54 = vadd.f32 %v4975_v21, %v4062_v30  ;;  %v4879_v56 = vadd.f32 %v4878_v51, %v4852_v29 }
 0x484   : > { %v4926_v15 = vpop.f32.mrf.mxu1 }
 0x485   : > { %v4903_v55 = vadd.f32 %v4902_v46, %v4879_v56  ;;  %v4950_v57 = vpop.f32.mrf.mxu2  ;;  %v5019_v60 = vpop.f32.mrf.mxu0 }
 0x487   : > { %v4927_v61 = vadd.f32 %v4926_v15, %v4903_v55 }
 0x489   : > { %v4951_v2 = vadd.f32 %v4950_v57, %v4927_v61 }
 0x48a   : > { %v4972_v36 = vpop.f32.mrf.mxu3 }
 0x48b   : > { %v4973_v0 = vadd.f32 %v4972_v36, %v4951_v2 }
 0x48c   : > { %v5045_v39 = vpop.f32.mrf.mxu1 }
 0x48d   : > { %v4976_v3 = vadd.f32 %v4973_v0, %v4666_v16  ;;  %v5069_v10 = vpop.f32.mrf.mxu2  ;;  %v5117_v42 = vpop.f32.mrf.mxu0  ;;  %v5046_v11 = vadd.f32 %v5045_v39, %v5019_v60 }
 0x48f   : > { %v7122_v53 = vadd.f32 %v4976_v3, %v4063_v33  ;;  %v5070_v13 = vadd.f32 %v5069_v10, %v5046_v11 }
 0x492   : > { %v5093_v8 = vpop.f32.mrf.mxu3 }
 0x493   : > { %v5094_v50 = vadd.f32 %v5093_v8, %v5070_v13 }
 0x494   : > { %v5139_v12 = vpop.f32.mrf.mxu1 }
 0x495   : > { %v5165_v32 = vpop.f32.mrf.mxu2  ;;  %v5215_v62 = vpop.f32.mrf.mxu0  ;;  %v5118_v48 = vadd.f32 %v5117_v42, %v5094_v50 }
 0x497   : > { %v5140_v22 = vadd.f32 %v5139_v12, %v5118_v48 }
 0x49a   : > { %v5191_v63 = vpop.f32.mrf.mxu3 }
 0x49b   : > { %v5192_v28 = vadd.f32 %v5191_v63, %v5165_v32 }
 0x49c   : > { %v5239_v14 = vpop.f32.mrf.mxu1 }
 0x49d   : > { %v5263_v17 = vpop.f32.mrf.mxu2  ;;  %v5324_v19 = vpop.f32.mrf.mxu0  ;;  %v5216_v5 = vadd.f32 %v5215_v62, %v5192_v28 }
 0x49e   : > { %v5325_v43 = vadd.f32 %v5324_v19, %v5140_v22 }
 0x49f   : > { %v5240_v34 = vadd.f32 %v5239_v14, %v5216_v5 }
 0x4a1   : > { %v5264_v24 = vadd.f32 %v5263_v17, %v5240_v34 }
 0x4a2   : > { %v5285_v23 = vpop.f32.mrf.mxu3 }
 0x4a3   : > { %v5286_v6 = vadd.f32 %v5285_v23, %v5264_v24 }
 0x4a4   : > { %v5350_v52 = vpop.f32.mrf.mxu1 }
 0x4a5   : > { %v5374_v44 = vpop.f32.mrf.mxu2  ;;  %v5422_v7 = vpop.f32.mrf.mxu0  ;;  %v5351_v41 = vadd.f32 %v5350_v52, %v5325_v43 }
 0x4a7   : > { %v5375_v21 = vadd.f32 %v5374_v44, %v5351_v41 }
 0x4aa   : > { %v5398_v58 = vpop.f32.mrf.mxu3 }
 0x4ab   : > { %v5399_v56 = vadd.f32 %v5398_v58, %v5375_v21 }
 0x4ac   : > { %v5444_v26 = vpop.f32.mrf.mxu1 }
 0x4ad   : > { %v5470_v31 = vpop.f32.mrf.mxu2  ;;  %v5520_v35 = vpop.f32.mrf.mxu0  ;;  %v5423_v61 = vadd.f32 %v5422_v7, %v5399_v56 }
 0x4ae   : > { %v5471_v27 = vadd.f32 %v5470_v31, %v5286_v6 }
 0x4af   : > { %v5445_v42 = vadd.f32 %v5444_v26, %v5423_v61 }
 0x4b2   : > { %v5496_v37 = vpop.f32.mrf.mxu3 }
 0x4b3   : > { %v5497_v29 = vadd.f32 %v5496_v37, %v5471_v27 }
 0x4b4   : > { %v5544_v47 = vpop.f32.mrf.mxu1 }
 0x4b5   : > { %v5568_v18 = vpop.f32.mrf.mxu2  ;;  %v5631_v4 = vpop.f32.mrf.mxu0  ;;  %v5521_v15 = vadd.f32 %v5520_v35, %v5497_v29 }
 0x4b7   : > { %v5545_v2 = vadd.f32 %v5544_v47, %v5521_v15 }
 0x4b9   : > { %v5569_v33 = vadd.f32 %v5568_v18, %v5545_v2 }
 0x4ba   : > { %v5590_v9 = vpop.f32.mrf.mxu3 }
 0x4bb   : > { %v5591_v63 = vadd.f32 %v5590_v9, %v5569_v33 }
 0x4bc   : > { %v5657_v16 = vpop.f32.mrf.mxu1 }
 0x4bd   : > { %v5681_v20 = vpop.f32.mrf.mxu2  ;;  %v5658_v49 = vadd.f32 %v5657_v16, %v5631_v4 }
 0x4be   : > { %v5729_v40 = vpop.f32.mrf.mxu0 }
 0x4bf   : > { %v5682_v46 = vadd.f32 %v5681_v20, %v5658_v49 }
 0x4c2   : > { %v5705_v25 = vpop.f32.mrf.mxu3 }
 0x4c3   : > { %v5706_v30 = vadd.f32 %v5705_v25, %v5682_v46 }
 0x4c4   : > { %v5751_v38 = vpop.f32.mrf.mxu1 }
 0x4c5   : > { %v5777_v51 = vpop.f32.mrf.mxu2  ;;  %v5730_v55 = vadd.f32 %v5729_v40, %v5706_v30 }
 0x4c6   : > { %v5827_v60 = vpop.f32.mrf.mxu0 }
 0x4c7   : > { %v5752_v39 = vadd.f32 %v5751_v38, %v5730_v55 }
 0x4c9   : > { %v5900_v12 = vadd.f32 %v5752_v39, %v5445_v42 }
 0x4ca   : > { %v5803_v57 = vpop.f32.mrf.mxu3 }
 0x4cb   : > { %v5804_v36 = vadd.f32 %v5803_v57, %v5777_v51  ;;  %v5902_v19 = vsel %vm6804_vm12, %v5900_v12, 0.0 }
 0x4cc   : > { %v5851_v0 = vpop.f32.mrf.mxu1  ;;  %v5904_v52 = vadd.f32 %v5902_v19, %v7117_v54 }
 0x4cd   : > { %v5828_v3 = vadd.f32 %v5827_v60, %v5804_v36  ;;  %v5875_v10 = vpop.f32.mrf.mxu2 }
 0x4cf   : > { %v5852_v8 = vadd.f32 %v5851_v0, %v5828_v3 }
 0x4d1   : > { %v5876_v32 = vadd.f32 %v5875_v10, %v5852_v8 }
 0x4d2   : > { %v5897_v62 = vpop.f32.mrf.mxu3 }
 0x4d3   : > { %v5898_v14 = vadd.f32 %v5897_v62, %v5876_v32 }
 0x4d5   : > { %v5901_v17 = vadd.f32 %v5898_v14, %v5591_v63 }
 0x4d7   : > { %v5903_v23 = vsel %vm6809_vm13, %v5901_v17, 0.0 }
 0x4d8   : > { %v5905_v44 = vadd.f32 %v5903_v23, %v7122_v53 }
 0x4da   : > { %v5906_v7 = vadd.f32 %v5905_v44, %v5904_v52 }
 0x4dc   : > { %5907 = vadd.xlane.f32.xlu1 %v5906_v7 }
 0x54f   : > { %v5908_v58 = vpop.xlane.xlu1 %5907 }
 0x550   : > { %v5909_v26 = vmul.f32 %v5908_v58, %v6821_v59 }
 0x552   : > { %v5910_v31 = vsub.f32 %v5904_v52, %v5909_v26  ;;  %v5911_v35 = vsub.f32 %v5905_v44, %v5909_v26 }
 0x554   : > { %v5912_v11 = vmul.f32 %v5910_v31, %v5910_v31  ;;  %v5913_v28 = vmul.f32 %v5911_v35, %v5911_v35 }
 0x556   : > { %v5914_v45 = vadd.f32 %v5913_v28, %v5912_v11 }
 0x558   : > { %5915 = vadd.xlane.f32.xlu0 %v5914_v45 }
 0x5cb   : > { %v5916_v37 = vpop.xlane.xlu0 %5915 }
 0x5cc   : > { %v5917_v1 = vmul.f32 %v5916_v37, %v6821_v59 }
 0x5ce   : > { %v5918_v13 = vadd.f32 1e-05, %v5917_v1 }
 0x5d0   : > { %6094 = vrsqrt.f32 %v5918_v13  ;;  %vm5925_vm2 = vweird.f32 %v5918_v13 }
 0x5d6   : > { %v6095_v54 = vpop.eup %6094 }
 0x5d7   : > { %v5920_v53 = vmul.f32 %v6095_v54, %v5918_v13  ;;  %vm5926_vm1 = vweird.f32 %v6095_v54 }
 0x5d8   : > { %vm5927_vm4 = vmor %vm5925_vm2, %vm5926_vm1 }
 0x5d9   : > { %v5921_v5 = vmul.f32 %v6095_v54, %v5920_v53 }
 0x5db   : > { %v5922_v47 = vmul.f32 0.5, %v5921_v5 }
 0x5dd   : > { %v5923_v50 = vsub.f32 1.5, %v5922_v47 }
 0x5df   : > { %v5924_v18 = vmul.f32 %v6095_v54, %v5923_v50 }
 0x5e1   : > { %v5928_v4 = vsel %vm5927_vm4, %v6095_v54, %v5924_v18 }
 0x5e2   : > { %v5929_v59 = vmul.f32 %v5928_v4, %v5910_v31  ;;  %v5930_v34 = vmul.f32 %v5928_v4, %v5911_v35 }
 0x5e4   : > { %v5931_v48 = vmax.f32 %v5929_v59, 0.0  ;;  %v5932_v9 = vmax.f32 %v5930_v34, 0.0 }
 0x5e6   : > { %5933 = vst [vmem:[%s163_s9] sm:$0xff] %v5931_v48 }
 0x5e7   : > { %5934 = vst [vmem:[%s163_s9 + $0x8] sm:$0xff] %v5932_v9 }
 0x5e8   : > { %6123 = shalt.err (!%p6120_p3)
}
 0x5e9   : > { %6041 = dma.vmem_to_hbm [thread:$0]  (%p6228_p5), %s5950_s17, 256, %s5952_s24, %s5936_s16  }
 0x5ea PF: > { %p6047_p4 = scmp.ge.s32.totalorder %s6158_s15, 2  ;;  %s5963_s25 = sand.u32 1, %s6146_s12  }
 0x5eb   : > { %s5964_s26 = scalar_lea.sflag [#allocation5], %s5963_s25 }
 0x5ec   : > { %p6044_p7 = pnand %p6047_p4, %p6232_p6 }
 0x5ee   : > { %p6045_p8 = pneg %p6044_p7 }
 0x5f0   : > { %6141 = dma.done.wait (%p6045_p8), %s5964_s26, 256  }
 0x5f1   : > { %6143 = vsyncadd (%p6045_p8), %s5964_s26, 4294967040  ;;  %p13_p9 = scmp.ge.s32.totalorder %s6215_s18, 4   ;;  %s7243_s12 = smov %s6150_s13 }
 0x5f2   : > { %s7244_s13 = smov %s6154_s14  ;;  %s7245_s14 = smov %s6226_s21 }
 0x5f3   : > { %s7246_s15 = smov %s6215_s18  ;;  %15 = sbr.rel (!%p13_p9) target bundleno = 3 (0x3), region = 91 }
 0x5f8   :  { %5970 = vsyncpa [#allocation5], 1 }
 0x5f9   :  { %5972 = vsyncpa [#allocation5 + $0x1], 1 }

</bundles_post_ra>
